<compile_context>
chip_gen: v7x
topology: tpu7x:2x2x1
jax: 0.10.0
libtpu: 0.0.40
codegen_flags: <defaults>
</compile_context>

<pallas_src>
import math
import functools

import jax
import jax.numpy as jnp
from jax.experimental import pallas as pl
from jax.experimental.pallas import tpu as pltpu

LN_EPS = 1e-5                       # nn.LayerNorm default
_NEG_BIG = -1e30                    # finite additive mask value (f32 safe)
_VMEM_DEFAULT = 48 * 1024 * 1024    # conservative default (< v7x 64 MiB physical)


def _layernorm(x, gamma, beta):
    mu = jnp.mean(x, axis=-1, keepdims=True)
    xc = x - mu
    var = jnp.mean(xc * xc, axis=-1, keepdims=True)
    return xc * jax.lax.rsqrt(var + LN_EPS) * gamma + beta


def _new_gelu(x):
    c = math.sqrt(2.0 / math.pi)
    return 0.5 * x * (1.0 + jnp.tanh(c * (x + 0.044715 * x * x * x)))


# --------------- kernel 1: LN1 + fused QKV projection + head split ---------------
def _ln1_qkv_kernel(x_ref, g_ref, b_ref, w_ref, wb_ref,
                    q_ref, k_ref, v_ref, *, n_head):
    x = x_ref[0]                                                  # (ts, D) f32
    h = _layernorm(x, g_ref[0], b_ref[0])                         # f32 stats
    qkv = jnp.dot(h.astype(jnp.bfloat16), w_ref[...],             # bf16 x bf16 -> f32
                  preferred_element_type=jnp.float32) + wb_ref[0]
    qkv = qkv.astype(jnp.bfloat16)                                # (ts, 3D)
    d = x.shape[-1]
    hs = d // n_head
    # Head split folded in-kernel: static lane slices -> (B, H, T, hs) outputs.
    for hd in range(n_head):
        q_ref[0, hd] = qkv[:, hd * hs:(hd + 1) * hs]
        k_ref[0, hd] = qkv[:, d + hd * hs:d + (hd + 1) * hs]
        v_ref[0, hd] = qkv[:, 2 * d + hd * hs:2 * d + (hd + 1) * hs]


# ----------- kernel 2: causal flash attention (heads batched, merged out) --------
def _flash_kernel(q_ref, k_ref, v_ref, o_ref, m_scr, l_scr, acc_scr,
                  *, n_head, head_size):
    qi = pl.program_id(1)
    ki = pl.program_id(2)

    @pl.when(ki == 0)
    def _init():
        m_scr[...] = jnp.full(m_scr.shape, -jnp.inf, jnp.float32)
        l_scr[...] = jnp.zeros(l_scr.shape, jnp.float32)
        acc_scr[...] = jnp.zeros(acc_scr.shape, jnp.float32)

    def _step(apply_mask):
        q = q_ref[0]                      # (H, tq, hs) bf16, 1/sqrt(hs) folded in
        k = k_ref[0]                      # (H, tk, hs) bf16
        v = v_ref[0]                      # (H, tk, hs) bf16

        # One batched contraction for all heads (no per-head slices / concat).
        s = jnp.einsum("hqd,hkd->hqk", q, k,
                       preferred_element_type=jnp.float32)        # (H, tq, tk)

        if apply_mask:
            # Diagonal tile only: qi == ki and tq == tk, so the mask is simply
            # row >= col (no offset math); jnp.where avoids an extra f32 add.
            tq, tk = s.shape[1], s.shape[2]
            row = jax.lax.broadcasted_iota(jnp.int32, (tq, tk), 0)
            col = jax.lax.broadcasted_iota(jnp.int32, (tq, tk), 1)
            s = jnp.where((row >= col)[None, :, :], s, _NEG_BIG)

        m_prev = m_scr[...]                                       # (H, tq, 1)
        m_new = jnp.maximum(m_prev, s.max(axis=-1, keepdims=True))
        alpha = jnp.exp(m_prev - m_new)
        p = jnp.exp(s - m_new)
        l_scr[...] = alpha * l_scr[...] + p.sum(axis=-1, keepdims=True)
        acc_scr[...] = alpha * acc_scr[...] + jnp.einsum(
            "hqk,hkd->hqd", p.astype(v.dtype), v,
            preferred_element_type=jnp.float32)
        m_scr[...] = m_new

    # Interior (fully visible) tiles: no mask math at all.
    @pl.when(ki < qi)
    def _interior():
        _step(apply_mask=False)

    # Diagonal tile: apply the causal mask.  Tiles with ki > qi are fully
    # masked and are skipped entirely (and their K/V DMAs are elided via the
    # clamped index map in the BlockSpec).
    @pl.when(ki == qi)
    def _diag():
        _step(apply_mask=True)

    @pl.when(ki == pl.num_programs(2) - 1)
    def _finalize():
        inv_l = pl.reciprocal(l_scr[...], approx=True)            # EUP slot
        acc = acc_scr[...] * inv_l                                # (H, tq, hs)
        # Head merge folded in-kernel: lane-dense (tq, D) output tile.
        for hd in range(n_head):
            o_ref[0, :, hd * head_size:(hd + 1) * head_size] = \
                acc[hd].astype(o_ref.dtype)


# ------- kernel 3: attn c_proj + LN2 + MLP (hidden dim streamed via grid) --------
def _proj_ln2_mlp_kernel(y_ref, wap_ref, bap_ref, g2_ref, b2_ref,
                         wfc_ref, bfc_ref, wmp_ref, bmp_ref, o_ref,
                         h2_scr, acc_scr):
    c = pl.program_id(2)

    # att c_proj + LN2 computed once per (batch, seq-tile), at the first chunk.
    @pl.when(c == 0)
    def _head():
        att = jnp.dot(y_ref[0], wap_ref[...],
                      preferred_element_type=jnp.float32) + bap_ref[0]
        h2_scr[...] = _layernorm(att, g2_ref[0], b2_ref[0]).astype(jnp.bfloat16)
        acc_scr[...] = jnp.zeros(acc_scr.shape, jnp.float32)

    # One streamed hidden chunk: fc slice -> GELU -> partial c_proj accumulate.
    m = jnp.dot(h2_scr[...], wfc_ref[...],
                preferred_element_type=jnp.float32) + bfc_ref[0]
    g = _new_gelu(m).astype(jnp.bfloat16)
    acc_scr[...] += jnp.dot(g, wmp_ref[...], preferred_element_type=jnp.float32)

    # dropout(p=0) == identity
    @pl.when(c == pl.num_programs(2) - 1)
    def _tail():
        o_ref[0] = (acc_scr[...] + bmp_ref[0]).astype(o_ref.dtype)


def _const_spec(shape, n_grid_axes):
    """Grid-invariant full-array spec: fetched once, DMA elided afterwards."""
    zeros = (0,) * len(shape)
    if n_grid_axes == 2:
        return pl.BlockSpec(shape, lambda b, t: zeros)
    return pl.BlockSpec(shape, lambda b, t, c: zeros)


def _pick_mlp_chunk(hidden, target=512):
    """Largest lane-friendly divisor of `hidden` that is <= target."""
    if hidden <= target:
        return hidden
    for cand in range(target, 127, -128):
        if cand % 128 == 0 and hidden % cand == 0:
            return cand
    for cand in range(target, 0, -1):
        if hidden % cand == 0:
            return cand
    return hidden


def _hw_config():
    """Pick (seq_tile, vmem_limit_bytes) from the local TPU generation."""
    tile = 256                          # good default for v6e/v7x (2x256^2 MXU)
    vmem = _VMEM_DEFAULT
    try:
        kind = jax.devices()[0].device_kind.lower()
    except Exception:
        kind = ""
    if "v5 lite" in kind or "v5lite" in kind or "v5e" in kind:
        tile = 128                      # v5e MXU is 4x128x128; smaller score temporaries
    try:
        phys = int(pltpu.get_tpu_info().vmem_capacity_bytes)
        # ~75% of physical VMEM: ~48 MiB on v7x (64 MiB), ~96 MiB on v5e/v6e (128 MiB).
        vmem = min((phys * 3) // 4, 100 * 1024 * 1024)
    except Exception:
        pass
    return tile, vmem


@functools.partial(jax.jit,
                   static_argnames=("n_head", "seq_tile", "vmem_limit_bytes"))
def block_forward(x, params, n_head, seq_tile=256,
                  vmem_limit_bytes=_VMEM_DEFAULT):
    (ln1_g, ln1_b, w_attn, b_attn, w_aproj, b_aproj,
     ln2_g, ln2_b, w_fc, b_fc, w_mproj, b_mproj) = params
    B, T, D = x.shape
    H = n_head
    assert D % H == 0, "n_embd must be divisible by n_head"
    hs = D // H
    tile = min(seq_tile, T)
    assert T % tile == 0, "T must be divisible by the sequence tile"
    nT = T // tile
    hidden = w_fc.shape[1]
    mlp_chunk = _pick_mlp_chunk(hidden)
    n_chunks = hidden // mlp_chunk

    # Fold 1/sqrt(hs) into the Q projection (exact in f32; removes the per-score scale).
    scale = 1.0 / math.sqrt(hs)
    w_attn = w_attn.at[:, :D].multiply(scale)
    b_attn = b_attn.at[:, :D].multiply(scale)

    bf16 = jnp.bfloat16
    w_qkv = w_attn.astype(bf16)      # MXU is bf16-native; accumulate in f32
    w_ap = w_aproj.astype(bf16)
    w_fc_b = w_fc.astype(bf16)
    w_mp = w_mproj.astype(bf16)

    cp2 = pltpu.CompilerParams(
        dimension_semantics=("parallel", "parallel"),
        vmem_limit_bytes=vmem_limit_bytes)
    cp3 = pltpu.CompilerParams(
        dimension_semantics=("parallel", "parallel", "arbitrary"),
        vmem_limit_bytes=vmem_limit_bytes)

    # ---- pass 1: LN1 + QKV projection, head split folded in -> 3x (B,H,T,hs) ----
    q, k, v = pl.pallas_call(
        functools.partial(_ln1_qkv_kernel, n_head=H),
        out_shape=(jax.ShapeDtypeStruct((B, H, T, hs), bf16),) * 3,
        grid_spec=pltpu.PrefetchScalarGridSpec(
            num_scalar_prefetch=0,
            grid=(B, nT),
            in_specs=[
                pl.BlockSpec((1, tile, D), lambda b, t: (b, t, 0)),
                _const_spec(ln1_g.shape, 2), _const_spec(ln1_b.shape, 2),
                _const_spec(w_qkv.shape, 2), _const_spec(b_attn.shape, 2),
            ],
            out_specs=[
                pl.BlockSpec((1, H, tile, hs), lambda b, t: (b, 0, t, 0)),
                pl.BlockSpec((1, H, tile, hs), lambda b, t: (b, 0, t, 0)),
                pl.BlockSpec((1, H, tile, hs), lambda b, t: (b, 0, t, 0)),
            ],
        ),
        compiler_params=cp2,
    )(x, ln1_g, ln1_b, w_qkv, b_attn)

    # ---- pass 2: causal flash attention over (B, q-tile, kv-tile) ---------------
    # K/V index maps clamp j to i: causally-dead tiles repeat the previous block
    # index, so Pallas elides their DMAs (the pl.when guard skips the compute).
    y = pl.pallas_call(
        functools.partial(_flash_kernel, n_head=H, head_size=hs),
        out_shape=jax.ShapeDtypeStruct((B, T, D), bf16),
        grid_spec=pltpu.PrefetchScalarGridSpec(
            num_scalar_prefetch=0,
            grid=(B, nT, nT),
            in_specs=[
                pl.BlockSpec((1, H, tile, hs), lambda b, i, j: (b, 0, i, 0)),
                pl.BlockSpec((1, H, tile, hs),
                             lambda b, i, j: (b, 0, jnp.minimum(j, i), 0)),
                pl.BlockSpec((1, H, tile, hs),
                             lambda b, i, j: (b, 0, jnp.minimum(j, i), 0)),
            ],
            # Lane-dense merged (T, D) output layout (head merge folded in-kernel).
            out_specs=pl.BlockSpec((1, tile, D), lambda b, i, j: (b, i, 0)),
            scratch_shapes=[
                pltpu.VMEM((H, tile, 1), jnp.float32),    # running max  m
                pltpu.VMEM((H, tile, 1), jnp.float32),    # running sum  l
                pltpu.VMEM((H, tile, hs), jnp.float32),   # output accumulator
            ],
        ),
        compiler_params=pltpu.CompilerParams(
            dimension_semantics=("parallel", "parallel", "arbitrary"),
            vmem_limit_bytes=vmem_limit_bytes),
    )(q, k, v)

    # ---- pass 3: attn c_proj + LN2 + MLP with streamed hidden chunks ------------
    out = pl.pallas_call(
        _proj_ln2_mlp_kernel,
        out_shape=jax.ShapeDtypeStruct((B, T, D), x.dtype),
        grid_spec=pltpu.PrefetchScalarGridSpec(
            num_scalar_prefetch=0,
            grid=(B, nT, n_chunks),
            in_specs=[
                pl.BlockSpec((1, tile, D), lambda b, t, c: (b, t, 0)),
                _const_spec(w_ap.shape, 3), _const_spec(b_aproj.shape, 3),
                _const_spec(ln2_g.shape, 3), _const_spec(ln2_b.shape, 3),
                pl.BlockSpec((D, mlp_chunk), lambda b, t, c: (0, c)),   # w_fc slice
                pl.BlockSpec((1, mlp_chunk), lambda b, t, c: (0, c)),   # b_fc slice
                pl.BlockSpec((mlp_chunk, D), lambda b, t, c: (c, 0)),   # w_mproj slice
                _const_spec(b_mproj.shape, 3),
            ],
            out_specs=pl.BlockSpec((1, tile, D), lambda b, t, c: (b, t, 0)),
            scratch_shapes=[
                pltpu.VMEM((tile, D), jnp.bfloat16),      # LN2 output (reused per chunk)
                pltpu.VMEM((tile, D), jnp.float32),       # MLP c_proj accumulator
            ],
        ),
        compiler_params=cp3,
    )(y, w_ap, b_aproj, ln2_g, ln2_b, w_fc_b, b_fc, w_mp, b_mproj)

    return out


# ---------------------- pure-JAX fp32 reference for validation ------------------
def block_reference(x, params, n_head):
    (ln1_g, ln1_b, w_attn, b_attn, w_aproj, b_aproj,
     ln2_g, ln2_b, w_fc, b_fc, w_mproj, b_mproj) = params
    B, T, D = x.shape
    hs = D // n_head

    h = _layernorm(x, ln1_g[0], ln1_b[0])
    qkv = h @ w_attn + b_attn[0]
    q, k, v = jnp.split(qkv, 3, axis=-1)
    q = q.reshape(B, T, n_head, hs).transpose(0, 2, 1, 3)
    k = k.reshape(B, T, n_head, hs).transpose(0, 2, 1, 3)
    v = v.reshape(B, T, n_head, hs).transpose(0, 2, 1, 3)
    att = jnp.einsum("bhtd,bhsd->bhts", q, k) / math.sqrt(hs)
    mask = jnp.tril(jnp.ones((T, T), bool))
    att = jnp.where(mask, att, -jnp.inf)
    att = jax.nn.softmax(att, axis=-1)
    y = jnp.einsum("bhts,bhsd->bhtd", att, v)
    y = y.transpose(0, 2, 1, 3).reshape(B, T, D)
    y = y @ w_aproj + b_aproj[0]

    h2 = _layernorm(y, ln2_g[0], ln2_b[0])
    m = _new_gelu(h2 @ w_fc + b_fc[0])
    return m @ w_mproj + b_mproj[0]


if __name__ == "__main__":
    B, T, D, n_head = 2, 8, 32, 4
    key = jax.random.PRNGKey(0)
    keys = jax.random.split(key, 16)

    x = jax.random.normal(keys[0], (B, T, D), jnp.float32)

    def nrm(k, shape, scale=0.02):
        return (scale * jax.random.normal(k, shape)).astype(jnp.float32)

    params = (
        # ln_1: weight, bias (kept as (1, D) for 2-D VMEM layout)
        1.0 + nrm(keys[1], (1, D)),
        nrm(keys[2], (1, D)),
        # attn.c_attn: (D, 3D), (1, 3D)
        nrm(keys[3], (D, 3 * D)),
        nrm(keys[4], (1, 3 * D)),
        # attn.c_proj: (D, D), (1, D)
        nrm(keys[5], (D, D)),
        nrm(keys[6], (1, D)),
        # ln_2: weight, bias
        1.0 + nrm(keys[7], (1, D)),
        nrm(keys[8], (1, D)),
        # mlp.c_fc: (D, 4D), (1, 4D)
        nrm(keys[9], (D, 4 * D)),
        nrm(keys[10], (1, 4 * D)),
        # mlp.c_proj: (4D, D), (1, D)
        nrm(keys[11], (4 * D, D)),
        nrm(keys[12], (1, D)),
    )

    seq_tile, vmem_limit = _hw_config()
    out = block_forward(x, params, n_head=n_head,
                        seq_tile=seq_tile, vmem_limit_bytes=vmem_limit)
    out = jax.block_until_ready(out)

    ref = block_reference(x, params, n_head)
    assert out.shape == (B, T, D) and out.dtype == jnp.float32
    # bf16 matmul operands (f32 accumulation) vs. a pure-f32 reference.
    err = float(jnp.max(jnp.abs(out - ref)))
    assert jnp.allclose(out, ref, atol=1e-2, rtol=1e-2), err

    print("KERNEL_OK")
</pallas_src>

<mosaic_0001>
module attributes {stable_mosaic.version = 11 : i64} {
  func.func @_ln1_qkv_kernel(%arg0: i32, %arg1: i32, %arg2: memref<1x8x32xf32, #tpu.memory_space<vmem>>, %arg3: memref<1x32xf32, #tpu.memory_space<vmem>>, %arg4: memref<1x32xf32, #tpu.memory_space<vmem>>, %arg5: memref<32x96xbf16, #tpu.memory_space<vmem>>, %arg6: memref<1x96xf32, #tpu.memory_space<vmem>>, %arg7: memref<1x4x8x8xbf16, #tpu.memory_space<vmem>>, %arg8: memref<1x4x8x8xbf16, #tpu.memory_space<vmem>>, %arg9: memref<1x4x8x8xbf16, #tpu.memory_space<vmem>>) attributes {dimension_semantics = [#tpu.dimension_semantics<parallel>, #tpu.dimension_semantics<parallel>], iteration_bounds = array<i64: 2, 1>, scalar_prefetch = 0 : i64, scratch_operands = 0 : i64, tpu.core_type = #tpu.core_type<tc>, window_params = [{transform_indices = @transform_0, window_bounds = array<i64: 1, 8, 32>}, {pipeline_mode = #tpu.pipeline_mode<synchronous>, transform_indices = @transform_1, window_bounds = array<i64: 1, 32>}, {pipeline_mode = #tpu.pipeline_mode<synchronous>, transform_indices = @transform_2, window_bounds = array<i64: 1, 32>}, {pipeline_mode = #tpu.pipeline_mode<synchronous>, transform_indices = @transform_3, window_bounds = array<i64: 32, 96>}, {pipeline_mode = #tpu.pipeline_mode<synchronous>, transform_indices = @transform_4, window_bounds = array<i64: 1, 96>}, {transform_indices = @transform_5, window_bounds = array<i64: 1, 4, 8, 8>}, {transform_indices = @transform_6, window_bounds = array<i64: 1, 4, 8, 8>}, {transform_indices = @transform_7, window_bounds = array<i64: 1, 4, 8, 8>}]} {
    %c0 = arith.constant 0 : index
    %c0_0 = arith.constant 0 : index
    %c0_1 = arith.constant 0 : index
    %0 = vector.load %arg2[%c0, %c0_0, %c0_1] : memref<1x8x32xf32, #tpu.memory_space<vmem>>, vector<1x8x32xf32>
    %1 = vector.shape_cast %0 : vector<1x8x32xf32> to vector<8x32xf32>
    %c0_2 = arith.constant 0 : index
    %c0_3 = arith.constant 0 : index
    %2 = vector.load %arg3[%c0_2, %c0_3] : memref<1x32xf32, #tpu.memory_space<vmem>>, vector<1x32xf32>
    %3 = vector.shape_cast %2 : vector<1x32xf32> to vector<32xf32>
    %c0_4 = arith.constant 0 : index
    %c0_5 = arith.constant 0 : index
    %4 = vector.load %arg4[%c0_4, %c0_5] : memref<1x32xf32, #tpu.memory_space<vmem>>, vector<1x32xf32>
    %5 = vector.shape_cast %4 : vector<1x32xf32> to vector<32xf32>
    %cst = arith.constant dense<0.000000e+00> : vector<8xf32>
    %6 = vector.multi_reduction <add>, %1, %cst [1] : vector<8x32xf32> to vector<8xf32>
    %7 = vector.shape_cast %6 : vector<8xf32> to vector<8x1xf32>
    %cst_6 = arith.constant 3.200000e+01 : f32
    %8 = vector.broadcast %cst_6 : f32 to vector<8x1xf32>
    %9 = arith.divf %7, %8 : vector<8x1xf32>
    %10 = vector.broadcast %9 : vector<8x1xf32> to vector<8x32xf32>
    %11 = arith.subf %1, %10 : vector<8x32xf32>
    %12 = arith.mulf %11, %11 : vector<8x32xf32>
    %cst_7 = arith.constant dense<0.000000e+00> : vector<8xf32>
    %13 = vector.multi_reduction <add>, %12, %cst_7 [1] : vector<8x32xf32> to vector<8xf32>
    %14 = vector.shape_cast %13 : vector<8xf32> to vector<8x1xf32>
    %cst_8 = arith.constant 3.200000e+01 : f32
    %15 = vector.broadcast %cst_8 : f32 to vector<8x1xf32>
    %16 = arith.divf %14, %15 : vector<8x1xf32>
    %cst_9 = arith.constant 9.99999974E-6 : f32
    %17 = vector.broadcast %cst_9 : f32 to vector<8x1xf32>
    %18 = arith.addf %16, %17 : vector<8x1xf32>
    %19 = math.rsqrt %18 : vector<8x1xf32>
    %20 = vector.broadcast %19 : vector<8x1xf32> to vector<8x32xf32>
    %21 = arith.mulf %11, %20 : vector<8x32xf32>
    %22 = vector.shape_cast %3 : vector<32xf32> to vector<1x32xf32>
    %23 = vector.broadcast %22 : vector<1x32xf32> to vector<8x32xf32>
    %24 = arith.mulf %21, %23 : vector<8x32xf32>
    %25 = vector.shape_cast %5 : vector<32xf32> to vector<1x32xf32>
    %26 = vector.broadcast %25 : vector<1x32xf32> to vector<8x32xf32>
    %27 = arith.addf %24, %26 : vector<8x32xf32>
    %28 = arith.truncf %27 : vector<8x32xf32> to vector<8x32xbf16>
    %c0_10 = arith.constant 0 : index
    %c0_11 = arith.constant 0 : index
    %29 = vector.load %arg5[%c0_10, %c0_11] : memref<32x96xbf16, #tpu.memory_space<vmem>>, vector<32x96xbf16>
    %cst_12 = arith.constant dense<0.000000e+00> : vector<8x96xf32>
    %30 = tpu.matmul %28, %29, %cst_12 {dimension_numbers = #tpu.dot_dimension_numbers<[1], [0], [0], [1], [0, 0, 1, 1], [], []>} : vector<8x32xbf16>, vector<32x96xbf16>, vector<8x96xf32> -> vector<8x96xf32>
    %c0_13 = arith.constant 0 : index
    %c0_14 = arith.constant 0 : index
    %31 = vector.load %arg6[%c0_13, %c0_14] : memref<1x96xf32, #tpu.memory_space<vmem>>, vector<1x96xf32>
    %32 = vector.shape_cast %31 : vector<1x96xf32> to vector<96xf32>
    %33 = vector.shape_cast %32 : vector<96xf32> to vector<1x96xf32>
    %34 = vector.broadcast %33 : vector<1x96xf32> to vector<8x96xf32>
    %35 = arith.addf %30, %34 : vector<8x96xf32>
    %36 = arith.truncf %35 : vector<8x96xf32> to vector<8x96xbf16>
    %37 = vector.extract_strided_slice %36 {offsets = [0, 0], sizes = [8, 8], strides = [1, 1]} : vector<8x96xbf16> to vector<8x8xbf16>
    %c0_15 = arith.constant 0 : index
    %c0_16 = arith.constant 0 : index
    %c0_17 = arith.constant 0 : index
    %c0_18 = arith.constant 0 : index
    %38 = vector.load %arg7[%c0_15, %c0_16, %c0_17, %c0_18] : memref<1x4x8x8xbf16, #tpu.memory_space<vmem>>, vector<1x1x8x8xbf16>
    %39 = vector.shape_cast %38 : vector<1x1x8x8xbf16> to vector<8x8xbf16>
    %40 = vector.shape_cast %37 : vector<8x8xbf16> to vector<1x1x8x8xbf16>
    tpu.vector_store %arg7[%c0_15, %c0_16, %c0_17, %c0_18], %40 {strides = array<i32>} : memref<1x4x8x8xbf16, #tpu.memory_space<vmem>>, vector<1x1x8x8xbf16>,
    %41 = vector.extract_strided_slice %36 {offsets = [0, 32], sizes = [8, 8], strides = [1, 1]} : vector<8x96xbf16> to vector<8x8xbf16>
    %c0_19 = arith.constant 0 : index
    %c0_20 = arith.constant 0 : index
    %c0_21 = arith.constant 0 : index
    %c0_22 = arith.constant 0 : index
    %42 = vector.load %arg8[%c0_19, %c0_20, %c0_21, %c0_22] : memref<1x4x8x8xbf16, #tpu.memory_space<vmem>>, vector<1x1x8x8xbf16>
    %43 = vector.shape_cast %42 : vector<1x1x8x8xbf16> to vector<8x8xbf16>
    %44 = vector.shape_cast %41 : vector<8x8xbf16> to vector<1x1x8x8xbf16>
    tpu.vector_store %arg8[%c0_19, %c0_20, %c0_21, %c0_22], %44 {strides = array<i32>} : memref<1x4x8x8xbf16, #tpu.memory_space<vmem>>, vector<1x1x8x8xbf16>,
    %45 = vector.extract_strided_slice %36 {offsets = [0, 64], sizes = [8, 8], strides = [1, 1]} : vector<8x96xbf16> to vector<8x8xbf16>
    %c0_23 = arith.constant 0 : index
    %c0_24 = arith.constant 0 : index
    %c0_25 = arith.constant 0 : index
    %c0_26 = arith.constant 0 : index
    %46 = vector.load %arg9[%c0_23, %c0_24, %c0_25, %c0_26] : memref<1x4x8x8xbf16, #tpu.memory_space<vmem>>, vector<1x1x8x8xbf16>
    %47 = vector.shape_cast %46 : vector<1x1x8x8xbf16> to vector<8x8xbf16>
    %48 = vector.shape_cast %45 : vector<8x8xbf16> to vector<1x1x8x8xbf16>
    tpu.vector_store %arg9[%c0_23, %c0_24, %c0_25, %c0_26], %48 {strides = array<i32>} : memref<1x4x8x8xbf16, #tpu.memory_space<vmem>>, vector<1x1x8x8xbf16>,
    %49 = vector.extract_strided_slice %36 {offsets = [0, 8], sizes = [8, 8], strides = [1, 1]} : vector<8x96xbf16> to vector<8x8xbf16>
    %c0_27 = arith.constant 0 : index
    %c1 = arith.constant 1 : index
    %c0_28 = arith.constant 0 : index
    %c0_29 = arith.constant 0 : index
    %50 = vector.load %arg7[%c0_27, %c1, %c0_28, %c0_29] : memref<1x4x8x8xbf16, #tpu.memory_space<vmem>>, vector<1x1x8x8xbf16>
    %51 = vector.shape_cast %50 : vector<1x1x8x8xbf16> to vector<8x8xbf16>
    %52 = vector.shape_cast %49 : vector<8x8xbf16> to vector<1x1x8x8xbf16>
    tpu.vector_store %arg7[%c0_27, %c1, %c0_28, %c0_29], %52 {strides = array<i32>} : memref<1x4x8x8xbf16, #tpu.memory_space<vmem>>, vector<1x1x8x8xbf16>,
    %53 = vector.extract_strided_slice %36 {offsets = [0, 40], sizes = [8, 8], strides = [1, 1]} : vector<8x96xbf16> to vector<8x8xbf16>
    %c0_30 = arith.constant 0 : index
    %c1_31 = arith.constant 1 : index
    %c0_32 = arith.constant 0 : index
    %c0_33 = arith.constant 0 : index
    %54 = vector.load %arg8[%c0_30, %c1_31, %c0_32, %c0_33] : memref<1x4x8x8xbf16, #tpu.memory_space<vmem>>, vector<1x1x8x8xbf16>
    %55 = vector.shape_cast %54 : vector<1x1x8x8xbf16> to vector<8x8xbf16>
    %56 = vector.shape_cast %53 : vector<8x8xbf16> to vector<1x1x8x8xbf16>
    tpu.vector_store %arg8[%c0_30, %c1_31, %c0_32, %c0_33], %56 {strides = array<i32>} : memref<1x4x8x8xbf16, #tpu.memory_space<vmem>>, vector<1x1x8x8xbf16>,
    %57 = vector.extract_strided_slice %36 {offsets = [0, 72], sizes = [8, 8], strides = [1, 1]} : vector<8x96xbf16> to vector<8x8xbf16>
    %c0_34 = arith.constant 0 : index
    %c1_35 = arith.constant 1 : index
    %c0_36 = arith.constant 0 : index
    %c0_37 = arith.constant 0 : index
    %58 = vector.load %arg9[%c0_34, %c1_35, %c0_36, %c0_37] : memref<1x4x8x8xbf16, #tpu.memory_space<vmem>>, vector<1x1x8x8xbf16>
    %59 = vector.shape_cast %58 : vector<1x1x8x8xbf16> to vector<8x8xbf16>
    %60 = vector.shape_cast %57 : vector<8x8xbf16> to vector<1x1x8x8xbf16>
    tpu.vector_store %arg9[%c0_34, %c1_35, %c0_36, %c0_37], %60 {strides = array<i32>} : memref<1x4x8x8xbf16, #tpu.memory_space<vmem>>, vector<1x1x8x8xbf16>,
    %61 = vector.extract_strided_slice %36 {offsets = [0, 16], sizes = [8, 8], strides = [1, 1]} : vector<8x96xbf16> to vector<8x8xbf16>
    %c0_38 = arith.constant 0 : index
    %c2 = arith.constant 2 : index
    %c0_39 = arith.constant 0 : index
    %c0_40 = arith.constant 0 : index
    %62 = vector.load %arg7[%c0_38, %c2, %c0_39, %c0_40] : memref<1x4x8x8xbf16, #tpu.memory_space<vmem>>, vector<1x1x8x8xbf16>
    %63 = vector.shape_cast %62 : vector<1x1x8x8xbf16> to vector<8x8xbf16>
    %64 = vector.shape_cast %61 : vector<8x8xbf16> to vector<1x1x8x8xbf16>
    tpu.vector_store %arg7[%c0_38, %c2, %c0_39, %c0_40], %64 {strides = array<i32>} : memref<1x4x8x8xbf16, #tpu.memory_space<vmem>>, vector<1x1x8x8xbf16>,
    %65 = vector.extract_strided_slice %36 {offsets = [0, 48], sizes = [8, 8], strides = [1, 1]} : vector<8x96xbf16> to vector<8x8xbf16>
    %c0_41 = arith.constant 0 : index
    %c2_42 = arith.constant 2 : index
    %c0_43 = arith.constant 0 : index
    %c0_44 = arith.constant 0 : index
    %66 = vector.load %arg8[%c0_41, %c2_42, %c0_43, %c0_44] : memref<1x4x8x8xbf16, #tpu.memory_space<vmem>>, vector<1x1x8x8xbf16>
    %67 = vector.shape_cast %66 : vector<1x1x8x8xbf16> to vector<8x8xbf16>
    %68 = vector.shape_cast %65 : vector<8x8xbf16> to vector<1x1x8x8xbf16>
    tpu.vector_store %arg8[%c0_41, %c2_42, %c0_43, %c0_44], %68 {strides = array<i32>} : memref<1x4x8x8xbf16, #tpu.memory_space<vmem>>, vector<1x1x8x8xbf16>,
    %69 = vector.extract_strided_slice %36 {offsets = [0, 80], sizes = [8, 8], strides = [1, 1]} : vector<8x96xbf16> to vector<8x8xbf16>
    %c0_45 = arith.constant 0 : index
    %c2_46 = arith.constant 2 : index
    %c0_47 = arith.constant 0 : index
    %c0_48 = arith.constant 0 : index
    %70 = vector.load %arg9[%c0_45, %c2_46, %c0_47, %c0_48] : memref<1x4x8x8xbf16, #tpu.memory_space<vmem>>, vector<1x1x8x8xbf16>
    %71 = vector.shape_cast %70 : vector<1x1x8x8xbf16> to vector<8x8xbf16>
    %72 = vector.shape_cast %69 : vector<8x8xbf16> to vector<1x1x8x8xbf16>
    tpu.vector_store %arg9[%c0_45, %c2_46, %c0_47, %c0_48], %72 {strides = array<i32>} : memref<1x4x8x8xbf16, #tpu.memory_space<vmem>>, vector<1x1x8x8xbf16>,
    %73 = vector.extract_strided_slice %36 {offsets = [0, 24], sizes = [8, 8], strides = [1, 1]} : vector<8x96xbf16> to vector<8x8xbf16>
    %c0_49 = arith.constant 0 : index
    %c3 = arith.constant 3 : index
    %c0_50 = arith.constant 0 : index
    %c0_51 = arith.constant 0 : index
    %74 = vector.load %arg7[%c0_49, %c3, %c0_50, %c0_51] : memref<1x4x8x8xbf16, #tpu.memory_space<vmem>>, vector<1x1x8x8xbf16>
    %75 = vector.shape_cast %74 : vector<1x1x8x8xbf16> to vector<8x8xbf16>
    %76 = vector.shape_cast %73 : vector<8x8xbf16> to vector<1x1x8x8xbf16>
    tpu.vector_store %arg7[%c0_49, %c3, %c0_50, %c0_51], %76 {strides = array<i32>} : memref<1x4x8x8xbf16, #tpu.memory_space<vmem>>, vector<1x1x8x8xbf16>,
    %77 = vector.extract_strided_slice %36 {offsets = [0, 56], sizes = [8, 8], strides = [1, 1]} : vector<8x96xbf16> to vector<8x8xbf16>
    %c0_52 = arith.constant 0 : index
    %c3_53 = arith.constant 3 : index
    %c0_54 = arith.constant 0 : index
    %c0_55 = arith.constant 0 : index
    %78 = vector.load %arg8[%c0_52, %c3_53, %c0_54, %c0_55] : memref<1x4x8x8xbf16, #tpu.memory_space<vmem>>, vector<1x1x8x8xbf16>
    %79 = vector.shape_cast %78 : vector<1x1x8x8xbf16> to vector<8x8xbf16>
    %80 = vector.shape_cast %77 : vector<8x8xbf16> to vector<1x1x8x8xbf16>
    tpu.vector_store %arg8[%c0_52, %c3_53, %c0_54, %c0_55], %80 {strides = array<i32>} : memref<1x4x8x8xbf16, #tpu.memory_space<vmem>>, vector<1x1x8x8xbf16>,
    %81 = vector.extract_strided_slice %36 {offsets = [0, 88], sizes = [8, 8], strides = [1, 1]} : vector<8x96xbf16> to vector<8x8xbf16>
    %c0_56 = arith.constant 0 : index
    %c3_57 = arith.constant 3 : index
    %c0_58 = arith.constant 0 : index
    %c0_59 = arith.constant 0 : index
    %82 = vector.load %arg9[%c0_56, %c3_57, %c0_58, %c0_59] : memref<1x4x8x8xbf16, #tpu.memory_space<vmem>>, vector<1x1x8x8xbf16>
    %83 = vector.shape_cast %82 : vector<1x1x8x8xbf16> to vector<8x8xbf16>
    %84 = vector.shape_cast %81 : vector<8x8xbf16> to vector<1x1x8x8xbf16>
    tpu.vector_store %arg9[%c0_56, %c3_57, %c0_58, %c0_59], %84 {strides = array<i32>} : memref<1x4x8x8xbf16, #tpu.memory_space<vmem>>, vector<1x1x8x8xbf16>,
    return
  }
  func.func @transform_0(%arg0: i32, %arg1: i32) -> (i32, i32, i32) {
    %c0_i32 = arith.constant 0 : i32
    %c0_i32_0 = arith.constant 0 : i32
    return %arg0, %arg1, %c0_i32 : i32, i32, i32
  }
  func.func @transform_1(%arg0: i32, %arg1: i32) -> (i32, i32) {
    %c0_i32 = arith.constant 0 : i32
    %c0_i32_0 = arith.constant 0 : i32
    %c0_i32_1 = arith.constant 0 : i32
    return %c0_i32, %c0_i32_0 : i32, i32
  }
  func.func @transform_2(%arg0: i32, %arg1: i32) -> (i32, i32) {
    %c0_i32 = arith.constant 0 : i32
    %c0_i32_0 = arith.constant 0 : i32
    %c0_i32_1 = arith.constant 0 : i32
    return %c0_i32, %c0_i32_0 : i32, i32
  }
  func.func @transform_3(%arg0: i32, %arg1: i32) -> (i32, i32) {
    %c0_i32 = arith.constant 0 : i32
    %c0_i32_0 = arith.constant 0 : i32
    %c0_i32_1 = arith.constant 0 : i32
    return %c0_i32, %c0_i32_0 : i32, i32
  }
  func.func @transform_4(%arg0: i32, %arg1: i32) -> (i32, i32) {
    %c0_i32 = arith.constant 0 : i32
    %c0_i32_0 = arith.constant 0 : i32
    %c0_i32_1 = arith.constant 0 : i32
    return %c0_i32, %c0_i32_0 : i32, i32
  }
  func.func @transform_5(%arg0: i32, %arg1: i32) -> (i32, i32, i32, i32) {
    %c0_i32 = arith.constant 0 : i32
    %c0_i32_0 = arith.constant 0 : i32
    %c0_i32_1 = arith.constant 0 : i32
    return %arg0, %c0_i32, %arg1, %c0_i32_0 : i32, i32, i32, i32
  }
  func.func @transform_6(%arg0: i32, %arg1: i32) -> (i32, i32, i32, i32) {
    %c0_i32 = arith.constant 0 : i32
    %c0_i32_0 = arith.constant 0 : i32
    %c0_i32_1 = arith.constant 0 : i32
    return %arg0, %c0_i32, %arg1, %c0_i32_0 : i32, i32, i32, i32
  }
  func.func @transform_7(%arg0: i32, %arg1: i32) -> (i32, i32, i32, i32) {
    %c0_i32 = arith.constant 0 : i32
    %c0_i32_0 = arith.constant 0 : i32
    %c0_i32_1 = arith.constant 0 : i32
    return %arg0, %c0_i32, %arg1, %c0_i32_0 : i32, i32, i32, i32
  }
}

module attributes {stable_mosaic.version = 11 : i64} {
  func.func @_flash_kernel(%arg0: i32, %arg1: i32, %arg2: i32, %arg3: memref<1x4x8x8xbf16, #tpu.memory_space<vmem>>, %arg4: memref<1x4x8x8xbf16, #tpu.memory_space<vmem>>, %arg5: memref<1x4x8x8xbf16, #tpu.memory_space<vmem>>, %arg6: memref<1x8x32xbf16, #tpu.memory_space<vmem>>, %arg7: memref<4x8x1xf32, #tpu.memory_space<vmem>>, %arg8: memref<4x8x1xf32, #tpu.memory_space<vmem>>, %arg9: memref<4x8x8xf32, #tpu.memory_space<vmem>>) attributes {dimension_semantics = [#tpu.dimension_semantics<parallel>, #tpu.dimension_semantics<parallel>, #tpu.dimension_semantics<arbitrary>], iteration_bounds = array<i64: 2, 1, 1>, scalar_prefetch = 0 : i64, scratch_operands = 3 : i64, tpu.core_type = #tpu.core_type<tc>, window_params = [{transform_indices = @transform_0, window_bounds = array<i64: 1, 4, 8, 8>}, {transform_indices = @transform_1, window_bounds = array<i64: 1, 4, 8, 8>}, {transform_indices = @transform_2, window_bounds = array<i64: 1, 4, 8, 8>}, {transform_indices = @transform_3, window_bounds = array<i64: 1, 8, 32>}]} {
    %c0_i32 = arith.constant 0 : i32
    %0 = arith.cmpi eq, %arg2, %c0_i32 : i32
    %1 = arith.extui %0 : i1 to i32
    %c0_i32_0 = arith.constant 0 : i32
    %2 = arith.cmpi ne, %1, %c0_i32_0 : i32
    scf.if %2 {
      %cst = arith.constant 0xFF800000 : f32
      %12 = vector.broadcast %cst : f32 to vector<4x8x1xf32>
      %c0 = arith.constant 0 : index
      %c0_5 = arith.constant 0 : index
      %c0_6 = arith.constant 0 : index
      %13 = vector.load %arg7[%c0, %c0_5, %c0_6] : memref<4x8x1xf32, #tpu.memory_space<vmem>>, vector<4x8x1xf32>
      tpu.vector_store %arg7[%c0, %c0_5, %c0_6], %12 {strides = array<i32>} : memref<4x8x1xf32, #tpu.memory_space<vmem>>, vector<4x8x1xf32>,
      %cst_7 = arith.constant 0.000000e+00 : f32
      %14 = vector.broadcast %cst_7 : f32 to vector<4x8x1xf32>
      %c0_8 = arith.constant 0 : index
      %c0_9 = arith.constant 0 : index
      %c0_10 = arith.constant 0 : index
      %15 = vector.load %arg8[%c0_8, %c0_9, %c0_10] : memref<4x8x1xf32, #tpu.memory_space<vmem>>, vector<4x8x1xf32>
      tpu.vector_store %arg8[%c0_8, %c0_9, %c0_10], %14 {strides = array<i32>} : memref<4x8x1xf32, #tpu.memory_space<vmem>>, vector<4x8x1xf32>,
      %cst_11 = arith.constant 0.000000e+00 : f32
      %16 = vector.broadcast %cst_11 : f32 to vector<4x8x8xf32>
      %c0_12 = arith.constant 0 : index
      %c0_13 = arith.constant 0 : index
      %c0_14 = arith.constant 0 : index
      %17 = vector.load %arg9[%c0_12, %c0_13, %c0_14] : memref<4x8x8xf32, #tpu.memory_space<vmem>>, vector<4x8x8xf32>
      tpu.vector_store %arg9[%c0_12, %c0_13, %c0_14], %16 {strides = array<i32>} : memref<4x8x8xf32, #tpu.memory_space<vmem>>, vector<4x8x8xf32>,
    } else {
    }
    %3 = arith.cmpi slt, %arg2, %arg1 : i32
    %4 = arith.extui %3 : i1 to i32
    %c0_i32_1 = arith.constant 0 : i32
    %5 = arith.cmpi ne, %4, %c0_i32_1 : i32
    scf.if %5 {
      %c0 = arith.constant 0 : index
      %c0_5 = arith.constant 0 : index
      %c0_6 = arith.constant 0 : index
      %c0_7 = arith.constant 0 : index
      %12 = vector.load %arg3[%c0, %c0_5, %c0_6, %c0_7] : memref<1x4x8x8xbf16, #tpu.memory_space<vmem>>, vector<1x4x8x8xbf16>
      %13 = vector.shape_cast %12 : vector<1x4x8x8xbf16> to vector<4x8x8xbf16>
      %c0_8 = arith.constant 0 : index
      %c0_9 = arith.constant 0 : index
      %c0_10 = arith.constant 0 : index
      %c0_11 = arith.constant 0 : index
      %14 = vector.load %arg4[%c0_8, %c0_9, %c0_10, %c0_11] : memref<1x4x8x8xbf16, #tpu.memory_space<vmem>>, vector<1x4x8x8xbf16>
      %15 = vector.shape_cast %14 : vector<1x4x8x8xbf16> to vector<4x8x8xbf16>
      %c0_12 = arith.constant 0 : index
      %c0_13 = arith.constant 0 : index
      %c0_14 = arith.constant 0 : index
      %c0_15 = arith.constant 0 : index
      %16 = vector.load %arg5[%c0_12, %c0_13, %c0_14, %c0_15] : memref<1x4x8x8xbf16, #tpu.memory_space<vmem>>, vector<1x4x8x8xbf16>
      %17 = vector.shape_cast %16 : vector<1x4x8x8xbf16> to vector<4x8x8xbf16>
      "tpu.trace_start"() <{level = 10 : i32, message = "hqd,hkd->hqk"}> : () -> ()
      %cst = arith.constant dense<0.000000e+00> : vector<4x8x8xf32>
      %18 = tpu.matmul %13, %15, %cst {dimension_numbers = #tpu.dot_dimension_numbers<[2], [2], [1], [1], [0, 0, 0, 1, 1, 1], [0], [0]>} : vector<4x8x8xbf16>, vector<4x8x8xbf16>, vector<4x8x8xf32> -> vector<4x8x8xf32>
      "tpu.trace_stop"() : () -> ()
      %c0_16 = arith.constant 0 : index
      %c0_17 = arith.constant 0 : index
      %c0_18 = arith.constant 0 : index
      %19 = vector.load %arg7[%c0_16, %c0_17, %c0_18] : memref<4x8x1xf32, #tpu.memory_space<vmem>>, vector<4x8x1xf32>
      %cst_19 = arith.constant dense<0xFF800000> : vector<4x8xf32>
      %20 = vector.multi_reduction <maximumf>, %18, %cst_19 [2] : vector<4x8x8xf32> to vector<4x8xf32>
      %21 = vector.shape_cast %20 : vector<4x8xf32> to vector<4x8x1xf32>
      %22 = arith.maximumf %19, %21 : vector<4x8x1xf32>
      %23 = arith.subf %19, %22 : vector<4x8x1xf32>
      %24 = math.exp %23 : vector<4x8x1xf32>
      %25 = vector.broadcast %22 : vector<4x8x1xf32> to vector<4x8x8xf32>
      %26 = arith.subf %18, %25 : vector<4x8x8xf32>
      %27 = math.exp %26 : vector<4x8x8xf32>
      %c0_20 = arith.constant 0 : index
      %c0_21 = arith.constant 0 : index
      %c0_22 = arith.constant 0 : index
      %28 = vector.load %arg8[%c0_20, %c0_21, %c0_22] : memref<4x8x1xf32, #tpu.memory_space<vmem>>, vector<4x8x1xf32>
      %29 = arith.mulf %24, %28 : vector<4x8x1xf32>
      %cst_23 = arith.constant dense<0.000000e+00> : vector<4x8xf32>
      %30 = vector.multi_reduction <add>, %27, %cst_23 [2] : vector<4x8x8xf32> to vector<4x8xf32>
      %31 = vector.shape_cast %30 : vector<4x8xf32> to vector<4x8x1xf32>
      %32 = arith.addf %29, %31 : vector<4x8x1xf32>
      %c0_24 = arith.constant 0 : index
      %c0_25 = arith.constant 0 : index
      %c0_26 = arith.constant 0 : index
      %33 = vector.load %arg8[%c0_24, %c0_25, %c0_26] : memref<4x8x1xf32, #tpu.memory_space<vmem>>, vector<4x8x1xf32>
      tpu.vector_store %arg8[%c0_24, %c0_25, %c0_26], %32 {strides = array<i32>} : memref<4x8x1xf32, #tpu.memory_space<vmem>>, vector<4x8x1xf32>,
      %c0_27 = arith.constant 0 : index
      %c0_28 = arith.constant 0 : index
      %c0_29 = arith.constant 0 : index
      %34 = vector.load %arg9[%c0_27, %c0_28, %c0_29] : memref<4x8x8xf32, #tpu.memory_space<vmem>>, vector<4x8x8xf32>
      %35 = vector.broadcast %24 : vector<4x8x1xf32> to vector<4x8x8xf32>
      %36 = arith.mulf %35, %34 : vector<4x8x8xf32>
      %37 = arith.truncf %27 : vector<4x8x8xf32> to vector<4x8x8xbf16>
      "tpu.trace_start"() <{level = 10 : i32, message = "hqk,hkd->hqd"}> : () -> ()
      %cst_30 = arith.constant dense<0.000000e+00> : vector<4x8x8xf32>
      %38 = tpu.matmul %37, %17, %cst_30 {dimension_numbers = #tpu.dot_dimension_numbers<[2], [1], [1], [2], [0, 0, 0, 1, 1, 2], [0], [0]>} : vector<4x8x8xbf16>, vector<4x8x8xbf16>, vector<4x8x8xf32> -> vector<4x8x8xf32>
      "tpu.trace_stop"() : () -> ()
      %39 = arith.addf %36, %38 : vector<4x8x8xf32>
      %c0_31 = arith.constant 0 : index
      %c0_32 = arith.constant 0 : index
      %c0_33 = arith.constant 0 : index
      %40 = vector.load %arg9[%c0_31, %c0_32, %c0_33] : memref<4x8x8xf32, #tpu.memory_space<vmem>>, vector<4x8x8xf32>
      tpu.vector_store %arg9[%c0_31, %c0_32, %c0_33], %39 {strides = array<i32>} : memref<4x8x8xf32, #tpu.memory_space<vmem>>, vector<4x8x8xf32>,
      %c0_34 = arith.constant 0 : index
      %c0_35 = arith.constant 0 : index
      %c0_36 = arith.constant 0 : index
      %41 = vector.load %arg7[%c0_34, %c0_35, %c0_36] : memref<4x8x1xf32, #tpu.memory_space<vmem>>, vector<4x8x1xf32>
      tpu.vector_store %arg7[%c0_34, %c0_35, %c0_36], %22 {strides = array<i32>} : memref<4x8x1xf32, #tpu.memory_space<vmem>>, vector<4x8x1xf32>,
    } else {
    }
    %6 = arith.cmpi eq, %arg2, %arg1 : i32
    %7 = arith.extui %6 : i1 to i32
    %c0_i32_2 = arith.constant 0 : i32
    %8 = arith.cmpi ne, %7, %c0_i32_2 : i32
    scf.if %8 {
      %c0 = arith.constant 0 : index
      %c0_5 = arith.constant 0 : index
      %c0_6 = arith.constant 0 : index
      %c0_7 = arith.constant 0 : index
      %12 = vector.load %arg3[%c0, %c0_5, %c0_6, %c0_7] : memref<1x4x8x8xbf16, #tpu.memory_space<vmem>>, vector<1x4x8x8xbf16>
      %13 = vector.shape_cast %12 : vector<1x4x8x8xbf16> to vector<4x8x8xbf16>
      %c0_8 = arith.constant 0 : index
      %c0_9 = arith.constant 0 : index
      %c0_10 = arith.constant 0 : index
      %c0_11 = arith.constant 0 : index
      %14 = vector.load %arg4[%c0_8, %c0_9, %c0_10, %c0_11] : memref<1x4x8x8xbf16, #tpu.memory_space<vmem>>, vector<1x4x8x8xbf16>
      %15 = vector.shape_cast %14 : vector<1x4x8x8xbf16> to vector<4x8x8xbf16>
      %c0_12 = arith.constant 0 : index
      %c0_13 = arith.constant 0 : index
      %c0_14 = arith.constant 0 : index
      %c0_15 = arith.constant 0 : index
      %16 = vector.load %arg5[%c0_12, %c0_13, %c0_14, %c0_15] : memref<1x4x8x8xbf16, #tpu.memory_space<vmem>>, vector<1x4x8x8xbf16>
      %17 = vector.shape_cast %16 : vector<1x4x8x8xbf16> to vector<4x8x8xbf16>
      "tpu.trace_start"() <{level = 10 : i32, message = "hqd,hkd->hqk"}> : () -> ()
      %cst = arith.constant dense<0.000000e+00> : vector<4x8x8xf32>
      %18 = tpu.matmul %13, %15, %cst {dimension_numbers = #tpu.dot_dimension_numbers<[2], [2], [1], [1], [0, 0, 0, 1, 1, 1], [0], [0]>} : vector<4x8x8xbf16>, vector<4x8x8xbf16>, vector<4x8x8xf32> -> vector<4x8x8xf32>
      "tpu.trace_stop"() : () -> ()
      %19 = tpu.iota {dimensions = array<i32: 0>} : vector<8x8xi32>
      %20 = tpu.iota {dimensions = array<i32: 1>} : vector<8x8xi32>
      %21 = arith.cmpi sge, %19, %20 : vector<8x8xi32>
      %22 = vector.shape_cast %21 : vector<8x8xi1> to vector<1x8x8xi1>
      %cst_16 = arith.constant -1.000000e+30 : f32
      %23 = vector.shape_cast %22 : vector<1x8x8xi1> to vector<1x8x8xi1>
      %24 = vector.broadcast %23 : vector<1x8x8xi1> to vector<4x8x8xi1>
      %25 = vector.broadcast %cst_16 : f32 to vector<4x8x8xf32>
      %26 = arith.select %24, %18, %25 : vector<4x8x8xi1>, vector<4x8x8xf32>
      %c0_17 = arith.constant 0 : index
      %c0_18 = arith.constant 0 : index
      %c0_19 = arith.constant 0 : index
      %27 = vector.load %arg7[%c0_17, %c0_18, %c0_19] : memref<4x8x1xf32, #tpu.memory_space<vmem>>, vector<4x8x1xf32>
      %cst_20 = arith.constant dense<0xFF800000> : vector<4x8xf32>
      %28 = vector.multi_reduction <maximumf>, %26, %cst_20 [2] : vector<4x8x8xf32> to vector<4x8xf32>
      %29 = vector.shape_cast %28 : vector<4x8xf32> to vector<4x8x1xf32>
      %30 = arith.maximumf %27, %29 : vector<4x8x1xf32>
      %31 = arith.subf %27, %30 : vector<4x8x1xf32>
      %32 = math.exp %31 : vector<4x8x1xf32>
      %33 = vector.broadcast %30 : vector<4x8x1xf32> to vector<4x8x8xf32>
      %34 = arith.subf %26, %33 : vector<4x8x8xf32>
      %35 = math.exp %34 : vector<4x8x8xf32>
      %c0_21 = arith.constant 0 : index
      %c0_22 = arith.constant 0 : index
      %c0_23 = arith.constant 0 : index
      %36 = vector.load %arg8[%c0_21, %c0_22, %c0_23] : memref<4x8x1xf32, #tpu.memory_space<vmem>>, vector<4x8x1xf32>
      %37 = arith.mulf %32, %36 : vector<4x8x1xf32>
      %cst_24 = arith.constant dense<0.000000e+00> : vector<4x8xf32>
      %38 = vector.multi_reduction <add>, %35, %cst_24 [2] : vector<4x8x8xf32> to vector<4x8xf32>
      %39 = vector.shape_cast %38 : vector<4x8xf32> to vector<4x8x1xf32>
      %40 = arith.addf %37, %39 : vector<4x8x1xf32>
      %c0_25 = arith.constant 0 : index
      %c0_26 = arith.constant 0 : index
      %c0_27 = arith.constant 0 : index
      %41 = vector.load %arg8[%c0_25, %c0_26, %c0_27] : memref<4x8x1xf32, #tpu.memory_space<vmem>>, vector<4x8x1xf32>
      tpu.vector_store %arg8[%c0_25, %c0_26, %c0_27], %40 {strides = array<i32>} : memref<4x8x1xf32, #tpu.memory_space<vmem>>, vector<4x8x1xf32>,
      %c0_28 = arith.constant 0 : index
      %c0_29 = arith.constant 0 : index
      %c0_30 = arith.constant 0 : index
      %42 = vector.load %arg9[%c0_28, %c0_29, %c0_30] : memref<4x8x8xf32, #tpu.memory_space<vmem>>, vector<4x8x8xf32>
      %43 = vector.broadcast %32 : vector<4x8x1xf32> to vector<4x8x8xf32>
      %44 = arith.mulf %43, %42 : vector<4x8x8xf32>
      %45 = arith.truncf %35 : vector<4x8x8xf32> to vector<4x8x8xbf16>
      "tpu.trace_start"() <{level = 10 : i32, message = "hqk,hkd->hqd"}> : () -> ()
      %cst_31 = arith.constant dense<0.000000e+00> : vector<4x8x8xf32>
      %46 = tpu.matmul %45, %17, %cst_31 {dimension_numbers = #tpu.dot_dimension_numbers<[2], [1], [1], [2], [0, 0, 0, 1, 1, 2], [0], [0]>} : vector<4x8x8xbf16>, vector<4x8x8xbf16>, vector<4x8x8xf32> -> vector<4x8x8xf32>
      "tpu.trace_stop"() : () -> ()
      %47 = arith.addf %44, %46 : vector<4x8x8xf32>
      %c0_32 = arith.constant 0 : index
      %c0_33 = arith.constant 0 : index
      %c0_34 = arith.constant 0 : index
      %48 = vector.load %arg9[%c0_32, %c0_33, %c0_34] : memref<4x8x8xf32, #tpu.memory_space<vmem>>, vector<4x8x8xf32>
      tpu.vector_store %arg9[%c0_32, %c0_33, %c0_34], %47 {strides = array<i32>} : memref<4x8x8xf32, #tpu.memory_space<vmem>>, vector<4x8x8xf32>,
      %c0_35 = arith.constant 0 : index
      %c0_36 = arith.constant 0 : index
      %c0_37 = arith.constant 0 : index
      %49 = vector.load %arg7[%c0_35, %c0_36, %c0_37] : memref<4x8x1xf32, #tpu.memory_space<vmem>>, vector<4x8x1xf32>
      tpu.vector_store %arg7[%c0_35, %c0_36, %c0_37], %30 {strides = array<i32>} : memref<4x8x1xf32, #tpu.memory_space<vmem>>, vector<4x8x1xf32>,
    } else {
    }
    %c0_i32_3 = arith.constant 0 : i32
    %9 = arith.cmpi eq, %arg2, %c0_i32_3 : i32
    %10 = arith.extui %9 : i1 to i32
    %c0_i32_4 = arith.constant 0 : i32
    %11 = arith.cmpi ne, %10, %c0_i32_4 : i32
    scf.if %11 {
      %c0 = arith.constant 0 : index
      %c0_5 = arith.constant 0 : index
      %c0_6 = arith.constant 0 : index
      %12 = vector.load %arg8[%c0, %c0_5, %c0_6] : memref<4x8x1xf32, #tpu.memory_space<vmem>>, vector<4x8x1xf32>
      %13 = tpu.reciprocal %12 {approx = true} : vector<4x8x1xf32> -> vector<4x8x1xf32>
      %c0_7 = arith.constant 0 : index
      %c0_8 = arith.constant 0 : index
      %c0_9 = arith.constant 0 : index
      %14 = vector.load %arg9[%c0_7, %c0_8, %c0_9] : memref<4x8x8xf32, #tpu.memory_space<vmem>>, vector<4x8x8xf32>
      %15 = vector.broadcast %13 : vector<4x8x1xf32> to vector<4x8x8xf32>
      %16 = arith.mulf %14, %15 : vector<4x8x8xf32>
      %17 = vector.extract_strided_slice %16 {offsets = [0, 0, 0], sizes = [1, 8, 8], strides = [1, 1, 1]} : vector<4x8x8xf32> to vector<1x8x8xf32>
      %18 = vector.shape_cast %17 : vector<1x8x8xf32> to vector<8x8xf32>
      %19 = arith.truncf %18 : vector<8x8xf32> to vector<8x8xbf16>
      %c0_10 = arith.constant 0 : index
      %c0_11 = arith.constant 0 : index
      %c0_12 = arith.constant 0 : index
      %20 = vector.load %arg6[%c0_10, %c0_11, %c0_12] : memref<1x8x32xbf16, #tpu.memory_space<vmem>>, vector<1x8x8xbf16>
      %21 = vector.shape_cast %20 : vector<1x8x8xbf16> to vector<8x8xbf16>
      %22 = vector.shape_cast %19 : vector<8x8xbf16> to vector<1x8x8xbf16>
      tpu.vector_store %arg6[%c0_10, %c0_11, %c0_12], %22 {strides = array<i32>} : memref<1x8x32xbf16, #tpu.memory_space<vmem>>, vector<1x8x8xbf16>,
      %23 = vector.extract_strided_slice %16 {offsets = [1, 0, 0], sizes = [1, 8, 8], strides = [1, 1, 1]} : vector<4x8x8xf32> to vector<1x8x8xf32>
      %24 = vector.shape_cast %23 : vector<1x8x8xf32> to vector<8x8xf32>
      %25 = arith.truncf %24 : vector<8x8xf32> to vector<8x8xbf16>
      %c0_13 = arith.constant 0 : index
      %c0_14 = arith.constant 0 : index
      %c8 = arith.constant 8 : index
      %26 = vector.load %arg6[%c0_13, %c0_14, %c8] : memref<1x8x32xbf16, #tpu.memory_space<vmem>>, vector<1x8x8xbf16>
      %27 = vector.shape_cast %26 : vector<1x8x8xbf16> to vector<8x8xbf16>
      %28 = vector.shape_cast %25 : vector<8x8xbf16> to vector<1x8x8xbf16>
      tpu.vector_store %arg6[%c0_13, %c0_14, %c8], %28 {strides = array<i32>} : memref<1x8x32xbf16, #tpu.memory_space<vmem>>, vector<1x8x8xbf16>,
      %29 = vector.extract_strided_slice %16 {offsets = [2, 0, 0], sizes = [1, 8, 8], strides = [1, 1, 1]} : vector<4x8x8xf32> to vector<1x8x8xf32>
      %30 = vector.shape_cast %29 : vector<1x8x8xf32> to vector<8x8xf32>
      %31 = arith.truncf %30 : vector<8x8xf32> to vector<8x8xbf16>
      %c0_15 = arith.constant 0 : index
      %c0_16 = arith.constant 0 : index
      %c16 = arith.constant 16 : index
      %32 = vector.load %arg6[%c0_15, %c0_16, %c16] : memref<1x8x32xbf16, #tpu.memory_space<vmem>>, vector<1x8x8xbf16>
      %33 = vector.shape_cast %32 : vector<1x8x8xbf16> to vector<8x8xbf16>
      %34 = vector.shape_cast %31 : vector<8x8xbf16> to vector<1x8x8xbf16>
      tpu.vector_store %arg6[%c0_15, %c0_16, %c16], %34 {strides = array<i32>} : memref<1x8x32xbf16, #tpu.memory_space<vmem>>, vector<1x8x8xbf16>,
      %35 = vector.extract_strided_slice %16 {offsets = [3, 0, 0], sizes = [1, 8, 8], strides = [1, 1, 1]} : vector<4x8x8xf32> to vector<1x8x8xf32>
      %36 = vector.shape_cast %35 : vector<1x8x8xf32> to vector<8x8xf32>
      %37 = arith.truncf %36 : vector<8x8xf32> to vector<8x8xbf16>
      %c0_17 = arith.constant 0 : index
      %c0_18 = arith.constant 0 : index
      %c24 = arith.constant 24 : index
      %38 = vector.load %arg6[%c0_17, %c0_18, %c24] : memref<1x8x32xbf16, #tpu.memory_space<vmem>>, vector<1x8x8xbf16>
      %39 = vector.shape_cast %38 : vector<1x8x8xbf16> to vector<8x8xbf16>
      %40 = vector.shape_cast %37 : vector<8x8xbf16> to vector<1x8x8xbf16>
      tpu.vector_store %arg6[%c0_17, %c0_18, %c24], %40 {strides = array<i32>} : memref<1x8x32xbf16, #tpu.memory_space<vmem>>, vector<1x8x8xbf16>,
    } else {
    }
    return
  }
  func.func @transform_0(%arg0: i32, %arg1: i32, %arg2: i32) -> (i32, i32, i32, i32) {
    %c0_i32 = arith.constant 0 : i32
    %c0_i32_0 = arith.constant 0 : i32
    %c0_i32_1 = arith.constant 0 : i32
    return %arg0, %c0_i32, %arg1, %c0_i32_0 : i32, i32, i32, i32
  }
  func.func @transform_1(%arg0: i32, %arg1: i32, %arg2: i32) -> (i32, i32, i32, i32) {
    %0 = arith.minsi %arg2, %arg1 : i32
    %c0_i32 = arith.constant 0 : i32
    %c0_i32_0 = arith.constant 0 : i32
    %c0_i32_1 = arith.constant 0 : i32
    return %arg0, %c0_i32, %0, %c0_i32_0 : i32, i32, i32, i32
  }
  func.func @transform_2(%arg0: i32, %arg1: i32, %arg2: i32) -> (i32, i32, i32, i32) {
    %0 = arith.minsi %arg2, %arg1 : i32
    %c0_i32 = arith.constant 0 : i32
    %c0_i32_0 = arith.constant 0 : i32
    %c0_i32_1 = arith.constant 0 : i32
    return %arg0, %c0_i32, %0, %c0_i32_0 : i32, i32, i32, i32
  }
  func.func @transform_3(%arg0: i32, %arg1: i32, %arg2: i32) -> (i32, i32, i32) {
    %c0_i32 = arith.constant 0 : i32
    %c0_i32_0 = arith.constant 0 : i32
    return %arg0, %arg1, %c0_i32 : i32, i32, i32
  }
}

module attributes {stable_mosaic.version = 11 : i64} {
  func.func @_proj_ln2_mlp_kernel(%arg0: i32, %arg1: i32, %arg2: i32, %arg3: memref<1x8x32xbf16, #tpu.memory_space<vmem>>, %arg4: memref<32x32xbf16, #tpu.memory_space<vmem>>, %arg5: memref<1x32xf32, #tpu.memory_space<vmem>>, %arg6: memref<1x32xf32, #tpu.memory_space<vmem>>, %arg7: memref<1x32xf32, #tpu.memory_space<vmem>>, %arg8: memref<32x128xbf16, #tpu.memory_space<vmem>>, %arg9: memref<1x128xf32, #tpu.memory_space<vmem>>, %arg10: memref<128x32xbf16, #tpu.memory_space<vmem>>, %arg11: memref<1x32xf32, #tpu.memory_space<vmem>>, %arg12: memref<1x8x32xf32, #tpu.memory_space<vmem>>, %arg13: memref<8x32xbf16, #tpu.memory_space<vmem>>, %arg14: memref<8x32xf32, #tpu.memory_space<vmem>>) attributes {dimension_semantics = [#tpu.dimension_semantics<parallel>, #tpu.dimension_semantics<parallel>, #tpu.dimension_semantics<arbitrary>], iteration_bounds = array<i64: 2, 1, 1>, scalar_prefetch = 0 : i64, scratch_operands = 2 : i64, tpu.core_type = #tpu.core_type<tc>, window_params = [{transform_indices = @transform_0, window_bounds = array<i64: 1, 8, 32>}, {pipeline_mode = #tpu.pipeline_mode<synchronous>, transform_indices = @transform_1, window_bounds = array<i64: 32, 32>}, {pipeline_mode = #tpu.pipeline_mode<synchronous>, transform_indices = @transform_2, window_bounds = array<i64: 1, 32>}, {pipeline_mode = #tpu.pipeline_mode<synchronous>, transform_indices = @transform_3, window_bounds = array<i64: 1, 32>}, {pipeline_mode = #tpu.pipeline_mode<synchronous>, transform_indices = @transform_4, window_bounds = array<i64: 1, 32>}, {transform_indices = @transform_5, window_bounds = array<i64: 32, 128>}, {transform_indices = @transform_6, window_bounds = array<i64: 1, 128>}, {transform_indices = @transform_7, window_bounds = array<i64: 128, 32>}, {pipeline_mode = #tpu.pipeline_mode<synchronous>, transform_indices = @transform_8, window_bounds = array<i64: 1, 32>}, {transform_indices = @transform_9, window_bounds = array<i64: 1, 8, 32>}]} {
    %c0_i32 = arith.constant 0 : i32
    %0 = arith.cmpi eq, %arg2, %c0_i32 : i32
    %1 = arith.extui %0 : i1 to i32
    %c0_i32_0 = arith.constant 0 : i32
    %2 = arith.cmpi ne, %1, %c0_i32_0 : i32
    scf.if %2 {
      %c0_19 = arith.constant 0 : index
      %c0_20 = arith.constant 0 : index
      %c0_21 = arith.constant 0 : index
      %33 = vector.load %arg3[%c0_19, %c0_20, %c0_21] : memref<1x8x32xbf16, #tpu.memory_space<vmem>>, vector<1x8x32xbf16>
      %34 = vector.shape_cast %33 : vector<1x8x32xbf16> to vector<8x32xbf16>
      %c0_22 = arith.constant 0 : index
      %c0_23 = arith.constant 0 : index
      %35 = vector.load %arg4[%c0_22, %c0_23] : memref<32x32xbf16, #tpu.memory_space<vmem>>, vector<32x32xbf16>
      %cst_24 = arith.constant dense<0.000000e+00> : vector<8x32xf32>
      %36 = tpu.matmul %34, %35, %cst_24 {dimension_numbers = #tpu.dot_dimension_numbers<[1], [0], [0], [1], [0, 0, 1, 1], [], []>} : vector<8x32xbf16>, vector<32x32xbf16>, vector<8x32xf32> -> vector<8x32xf32>
      %c0_25 = arith.constant 0 : index
      %c0_26 = arith.constant 0 : index
      %37 = vector.load %arg5[%c0_25, %c0_26] : memref<1x32xf32, #tpu.memory_space<vmem>>, vector<1x32xf32>
      %38 = vector.shape_cast %37 : vector<1x32xf32> to vector<32xf32>
      %39 = vector.shape_cast %38 : vector<32xf32> to vector<1x32xf32>
      %40 = vector.broadcast %39 : vector<1x32xf32> to vector<8x32xf32>
      %41 = arith.addf %36, %40 : vector<8x32xf32>
      %c0_27 = arith.constant 0 : index
      %c0_28 = arith.constant 0 : index
      %42 = vector.load %arg6[%c0_27, %c0_28] : memref<1x32xf32, #tpu.memory_space<vmem>>, vector<1x32xf32>
      %43 = vector.shape_cast %42 : vector<1x32xf32> to vector<32xf32>
      %c0_29 = arith.constant 0 : index
      %c0_30 = arith.constant 0 : index
      %44 = vector.load %arg7[%c0_29, %c0_30] : memref<1x32xf32, #tpu.memory_space<vmem>>, vector<1x32xf32>
      %45 = vector.shape_cast %44 : vector<1x32xf32> to vector<32xf32>
      %cst_31 = arith.constant dense<0.000000e+00> : vector<8xf32>
      %46 = vector.multi_reduction <add>, %41, %cst_31 [1] : vector<8x32xf32> to vector<8xf32>
      %47 = vector.shape_cast %46 : vector<8xf32> to vector<8x1xf32>
      %cst_32 = arith.constant 3.200000e+01 : f32
      %48 = vector.broadcast %cst_32 : f32 to vector<8x1xf32>
      %49 = arith.divf %47, %48 : vector<8x1xf32>
      %50 = vector.broadcast %49 : vector<8x1xf32> to vector<8x32xf32>
      %51 = arith.subf %41, %50 : vector<8x32xf32>
      %52 = arith.mulf %51, %51 : vector<8x32xf32>
      %cst_33 = arith.constant dense<0.000000e+00> : vector<8xf32>
      %53 = vector.multi_reduction <add>, %52, %cst_33 [1] : vector<8x32xf32> to vector<8xf32>
      %54 = vector.shape_cast %53 : vector<8xf32> to vector<8x1xf32>
      %cst_34 = arith.constant 3.200000e+01 : f32
      %55 = vector.broadcast %cst_34 : f32 to vector<8x1xf32>
      %56 = arith.divf %54, %55 : vector<8x1xf32>
      %cst_35 = arith.constant 9.99999974E-6 : f32
      %57 = vector.broadcast %cst_35 : f32 to vector<8x1xf32>
      %58 = arith.addf %56, %57 : vector<8x1xf32>
      %59 = math.rsqrt %58 : vector<8x1xf32>
      %60 = vector.broadcast %59 : vector<8x1xf32> to vector<8x32xf32>
      %61 = arith.mulf %51, %60 : vector<8x32xf32>
      %62 = vector.shape_cast %43 : vector<32xf32> to vector<1x32xf32>
      %63 = vector.broadcast %62 : vector<1x32xf32> to vector<8x32xf32>
      %64 = arith.mulf %61, %63 : vector<8x32xf32>
      %65 = vector.shape_cast %45 : vector<32xf32> to vector<1x32xf32>
      %66 = vector.broadcast %65 : vector<1x32xf32> to vector<8x32xf32>
      %67 = arith.addf %64, %66 : vector<8x32xf32>
      %68 = arith.truncf %67 : vector<8x32xf32> to vector<8x32xbf16>
      %c0_36 = arith.constant 0 : index
      %c0_37 = arith.constant 0 : index
      %69 = vector.load %arg13[%c0_36, %c0_37] : memref<8x32xbf16, #tpu.memory_space<vmem>>, vector<8x32xbf16>
      tpu.vector_store %arg13[%c0_36, %c0_37], %68 {strides = array<i32>} : memref<8x32xbf16, #tpu.memory_space<vmem>>, vector<8x32xbf16>,
      %cst_38 = arith.constant 0.000000e+00 : f32
      %70 = vector.broadcast %cst_38 : f32 to vector<8x32xf32>
      %c0_39 = arith.constant 0 : index
      %c0_40 = arith.constant 0 : index
      %71 = vector.load %arg14[%c0_39, %c0_40] : memref<8x32xf32, #tpu.memory_space<vmem>>, vector<8x32xf32>
      tpu.vector_store %arg14[%c0_39, %c0_40], %70 {strides = array<i32>} : memref<8x32xf32, #tpu.memory_space<vmem>>, vector<8x32xf32>,
    } else {
    }
    %c0 = arith.constant 0 : index
    %c0_1 = arith.constant 0 : index
    %3 = vector.load %arg13[%c0, %c0_1] : memref<8x32xbf16, #tpu.memory_space<vmem>>, vector<8x32xbf16>
    %c0_2 = arith.constant 0 : index
    %c0_3 = arith.constant 0 : index
    %4 = vector.load %arg8[%c0_2, %c0_3] : memref<32x128xbf16, #tpu.memory_space<vmem>>, vector<32x128xbf16>
    %cst = arith.constant dense<0.000000e+00> : vector<8x128xf32>
    %5 = tpu.matmul %3, %4, %cst {dimension_numbers = #tpu.dot_dimension_numbers<[1], [0], [0], [1], [0, 0, 1, 1], [], []>} : vector<8x32xbf16>, vector<32x128xbf16>, vector<8x128xf32> -> vector<8x128xf32>
    %c0_4 = arith.constant 0 : index
    %c0_5 = arith.constant 0 : index
    %6 = vector.load %arg9[%c0_4, %c0_5] : memref<1x128xf32, #tpu.memory_space<vmem>>, vector<1x128xf32>
    %7 = vector.shape_cast %6 : vector<1x128xf32> to vector<128xf32>
    %8 = vector.shape_cast %7 : vector<128xf32> to vector<1x128xf32>
    %9 = vector.broadcast %8 : vector<1x128xf32> to vector<8x128xf32>
    %10 = arith.addf %5, %9 : vector<8x128xf32>
    %cst_6 = arith.constant 5.000000e-01 : f32
    %11 = vector.broadcast %cst_6 : f32 to vector<8x128xf32>
    %12 = arith.mulf %11, %10 : vector<8x128xf32>
    %cst_7 = arith.constant 4.471500e-02 : f32
    %13 = vector.broadcast %cst_7 : f32 to vector<8x128xf32>
    %14 = arith.mulf %13, %10 : vector<8x128xf32>
    %15 = arith.mulf %14, %10 : vector<8x128xf32>
    %16 = arith.mulf %15, %10 : vector<8x128xf32>
    %17 = arith.addf %10, %16 : vector<8x128xf32>
    %cst_8 = arith.constant 0.797884583 : f32
    %18 = vector.broadcast %cst_8 : f32 to vector<8x128xf32>
    %19 = arith.mulf %18, %17 : vector<8x128xf32>
    %20 = math.tanh %19 : vector<8x128xf32>
    %cst_9 = arith.constant 1.000000e+00 : f32
    %21 = vector.broadcast %cst_9 : f32 to vector<8x128xf32>
    %22 = arith.addf %21, %20 : vector<8x128xf32>
    %23 = arith.mulf %12, %22 : vector<8x128xf32>
    %24 = arith.truncf %23 : vector<8x128xf32> to vector<8x128xbf16>
    %c0_10 = arith.constant 0 : index
    %c0_11 = arith.constant 0 : index
    %25 = vector.load %arg14[%c0_10, %c0_11] : memref<8x32xf32, #tpu.memory_space<vmem>>, vector<8x32xf32>
    %c0_12 = arith.constant 0 : index
    %c0_13 = arith.constant 0 : index
    %26 = vector.load %arg10[%c0_12, %c0_13] : memref<128x32xbf16, #tpu.memory_space<vmem>>, vector<128x32xbf16>
    %cst_14 = arith.constant dense<0.000000e+00> : vector<8x32xf32>
    %27 = tpu.matmul %24, %26, %cst_14 {dimension_numbers = #tpu.dot_dimension_numbers<[1], [0], [0], [1], [0, 0, 1, 1], [], []>} : vector<8x128xbf16>, vector<128x32xbf16>, vector<8x32xf32> -> vector<8x32xf32>
    %28 = arith.addf %25, %27 : vector<8x32xf32>
    %c0_15 = arith.constant 0 : index
    %c0_16 = arith.constant 0 : index
    %29 = vector.load %arg14[%c0_15, %c0_16] : memref<8x32xf32, #tpu.memory_space<vmem>>, vector<8x32xf32>
    tpu.vector_store %arg14[%c0_15, %c0_16], %28 {strides = array<i32>} : memref<8x32xf32, #tpu.memory_space<vmem>>, vector<8x32xf32>,
    %c0_i32_17 = arith.constant 0 : i32
    %30 = arith.cmpi eq, %arg2, %c0_i32_17 : i32
    %31 = arith.extui %30 : i1 to i32
    %c0_i32_18 = arith.constant 0 : i32
    %32 = arith.cmpi ne, %31, %c0_i32_18 : i32
    scf.if %32 {
      %c0_19 = arith.constant 0 : index
      %c0_20 = arith.constant 0 : index
      %33 = vector.load %arg14[%c0_19, %c0_20] : memref<8x32xf32, #tpu.memory_space<vmem>>, vector<8x32xf32>
      %c0_21 = arith.constant 0 : index
      %c0_22 = arith.constant 0 : index
      %34 = vector.load %arg11[%c0_21, %c0_22] : memref<1x32xf32, #tpu.memory_space<vmem>>, vector<1x32xf32>
      %35 = vector.shape_cast %34 : vector<1x32xf32> to vector<32xf32>
      %36 = vector.shape_cast %35 : vector<32xf32> to vector<1x32xf32>
      %37 = vector.broadcast %36 : vector<1x32xf32> to vector<8x32xf32>
      %38 = arith.addf %33, %37 : vector<8x32xf32>
      %c0_23 = arith.constant 0 : index
      %c0_24 = arith.constant 0 : index
      %c0_25 = arith.constant 0 : index
      %39 = vector.load %arg12[%c0_23, %c0_24, %c0_25] : memref<1x8x32xf32, #tpu.memory_space<vmem>>, vector<1x8x32xf32>
      %40 = vector.shape_cast %39 : vector<1x8x32xf32> to vector<8x32xf32>
      %41 = vector.shape_cast %38 : vector<8x32xf32> to vector<1x8x32xf32>
      tpu.vector_store %arg12[%c0_23, %c0_24, %c0_25], %41 {strides = array<i32>} : memref<1x8x32xf32, #tpu.memory_space<vmem>>, vector<1x8x32xf32>,
    } else {
    }
    return
  }
  func.func @transform_0(%arg0: i32, %arg1: i32, %arg2: i32) -> (i32, i32, i32) {
    %c0_i32 = arith.constant 0 : i32
    %c0_i32_0 = arith.constant 0 : i32
    return %arg0, %arg1, %c0_i32 : i32, i32, i32
  }
  func.func @transform_1(%arg0: i32, %arg1: i32, %arg2: i32) -> (i32, i32) {
    %c0_i32 = arith.constant 0 : i32
    %c0_i32_0 = arith.constant 0 : i32
    %c0_i32_1 = arith.constant 0 : i32
    return %c0_i32, %c0_i32_0 : i32, i32
  }
  func.func @transform_2(%arg0: i32, %arg1: i32, %arg2: i32) -> (i32, i32) {
    %c0_i32 = arith.constant 0 : i32
    %c0_i32_0 = arith.constant 0 : i32
    %c0_i32_1 = arith.constant 0 : i32
    return %c0_i32, %c0_i32_0 : i32, i32
  }
  func.func @transform_3(%arg0: i32, %arg1: i32, %arg2: i32) -> (i32, i32) {
    %c0_i32 = arith.constant 0 : i32
    %c0_i32_0 = arith.constant 0 : i32
    %c0_i32_1 = arith.constant 0 : i32
    return %c0_i32, %c0_i32_0 : i32, i32
  }
  func.func @transform_4(%arg0: i32, %arg1: i32, %arg2: i32) -> (i32, i32) {
    %c0_i32 = arith.constant 0 : i32
    %c0_i32_0 = arith.constant 0 : i32
    %c0_i32_1 = arith.constant 0 : i32
    return %c0_i32, %c0_i32_0 : i32, i32
  }
  func.func @transform_5(%arg0: i32, %arg1: i32, %arg2: i32) -> (i32, i32) {
    %c0_i32 = arith.constant 0 : i32
    %c0_i32_0 = arith.constant 0 : i32
    return %c0_i32, %arg2 : i32, i32
  }
  func.func @transform_6(%arg0: i32, %arg1: i32, %arg2: i32) -> (i32, i32) {
    %c0_i32 = arith.constant 0 : i32
    %c0_i32_0 = arith.constant 0 : i32
    return %c0_i32, %arg2 : i32, i32
  }
  func.func @transform_7(%arg0: i32, %arg1: i32, %arg2: i32) -> (i32, i32) {
    %c0_i32 = arith.constant 0 : i32
    %c0_i32_0 = arith.constant 0 : i32
    return %arg2, %c0_i32 : i32, i32
  }
  func.func @transform_8(%arg0: i32, %arg1: i32, %arg2: i32) -> (i32, i32) {
    %c0_i32 = arith.constant 0 : i32
    %c0_i32_0 = arith.constant 0 : i32
    %c0_i32_1 = arith.constant 0 : i32
    return %c0_i32, %c0_i32_0 : i32, i32
  }
  func.func @transform_9(%arg0: i32, %arg1: i32, %arg2: i32) -> (i32, i32, i32) {
    %c0_i32 = arith.constant 0 : i32
    %c0_i32_0 = arith.constant 0 : i32
    return %arg0, %arg1, %c0_i32 : i32, i32, i32
  }
}

</mosaic_0001>

<bundles_post_ra>
// kernel: block_forward.3
= control target key start
LH: loop header
LB: loop body
LE: loop exit
PB: predicated region body
PF: predicated region fallthrough
CT: control target
= control target key end

     0   :  { %s844_s24 = smov 0   ;;  %s846_s25 = smov 0   ;;  %s928_s0 = inlined_call_operand.vmem [shape: f32[2,8,32], index: 0, kind: input, shape index: {}]   ;;  %s929_s1 = inlined_call_operand.vmem [shape: f32[1,32], index: 1, kind: input, shape index: {}]   ;;  %s930_s2 = inlined_call_operand.vmem [shape: f32[1,32], index: 2, kind: input, shape index: {}]   ;;  %s931_s3 = inlined_call_operand.vmem [shape: bf16[32,96], index: 3, kind: input, shape index: {}]   ;;  %s932_s4 = inlined_call_operand.vmem [shape: f32[1,96], index: 4, kind: input, shape index: {}]   ;;  %s933_s5 = inlined_call_operand.vmem [shape: bf16[2,4,8,8], index: 5, kind: output, shape index: {0}]   ;;  %s934_s6 = inlined_call_operand.vmem [shape: bf16[2,4,8,8], index: 6, kind: output, shape index: {1}]   ;;  %s935_s7 = inlined_call_operand.vmem [shape: bf16[2,4,8,8], index: 7, kind: output, shape index: {2}]  }
   0x1   :  { %s848_s26 = smov 0  }
   0x2 LB: > { %s30_s27 = sadd.s32 1, %s785_s25  ;;  %p685_p0 = scmp.ge.s32.totalorder %s789_s26, 1  ;;  %s789_s26 = sphi %s848_s26, %s18_s26   ;;  %s785_s25 = sphi %s846_s25, %s937_s25   ;;  %s781_s24 = sphi %s844_s24, %s936_s24  }
   0x3   : > { %p32_p1 = scmp.ge.s32.totalorder %s30_s27, 2  ;;  %p264_p2 = scmp.lt.s32.totalorder %s789_s26, 3 }
   0x5   : > { %s939_s27 = smov (%p32_p1, %s30_s27), 0  ;;  %p265_p3 = pnand %p685_p0, %p264_p2 }
   0x6   : > { %p317_p4 = scmp.lt.s32.totalorder (!%p265_p3), %s781_s24, 1  ;;  %vm352_vm0 = vcmask (!%p265_p3), 261120   ;;  %v763_v7 = vld [vmem:[%s931_s3] sm:$0xff] (!%p265_p3)   ;;  %v791_v8 = vmov (!%p265_p3), 0.0   ;;  %vm792_vm1 = vmmov (!%p265_p3), 0   ;;  %v764_v9 = vld [vmem:[%s931_s3 + $0x8] sm:$0xff] (!%p265_p3)  }
   0x7   : > { %268 = sbr.rel (%p265_p3) target bundleno = 697 (0x2b9), region = 40  ;;  %718 = vmatprep.subr.bf16.mxu0 (!%p265_p3), %v791_v8  ;;  %722 = vmatprep.mubr.msk.bf16.mxu0 (!%p265_p3), %vm792_vm1, %v791_v8  ;;  %v693_v14 = vld [vmem:[%s929_s1] ss:$0 sm:$0xff] (!%p265_p3)  ;;  %vm449_vm2 = vcmask (!%p265_p3), 60416   ;;  %s793_s23 = smov (!%p265_p3), 120  }
   0x8   : > { %719 = vmatpush3.bf16.msra.mxu0 (!%p265_p3), %v763_v7  ;;  %v694_v16 = vld [vmem:[%s930_s2] ss:$0 sm:$0xff] (!%p265_p3)  ;;  %s796_s29 = smov (!%p265_p3), 64   ;;  %s797_s30 = smov (!%p265_p3), 88  }
   0x9   : > { %720 = vmatprep.subr.bf16.mxu0 (!%p265_p3), %v791_v8  ;;  %v695_v20 = vld [vmem:[%s932_s4] ss:$0 sm:$0xff] (!%p265_p3)  ;;  %s799_s9 = smov (!%p265_p3), 112   ;;  %s800_s10 = smov (!%p265_p3), 80  }
   0xa   : > { %s801_s11 = smov (!%p265_p3), 48   ;;  %s802_s12 = smov (!%p265_p3), 104  }
   0xb   : > { %s803_s13 = smov (!%p265_p3), 40  }
   0xc   : > { %721 = vmatpush3.bf16.msra.mxu0 (!%p265_p3), %v764_v9 }
   0xe   : > { %s941_s24 = smov (!%p317_p4, %s781_s24), 1 }
   0xf   : > { %s686_s28 = sshll.u32 %s941_s24, 3  ;;  %s887_s19 = sshll.u32 %s941_s24, 4 }
  0x10   : > { %s323_s8 = scalar_lea.vmem %s928_s0, %s686_s28  ;;  %s893_s22 = scalar_lea.vmem %s933_s5, %s887_s19 }
  0x11   : > { %v349_v0 = vld [vmem:[%s323_s8] sm:$0xff]  ;;  %s794_s28 = smov 96   ;;  %s795_s24 = smov 72  }
  0x12   : > { %v353_v1 = vsel %vm352_vm0, %v349_v0, 0.0  ;;  %s798_s8 = smov 56   ;;  %s339_s16 = scalar_lea.vmem %s934_s6, %s887_s19 }
  0x13   : > { %354 = vadd.xlane.f32.xlu0 %v353_v1  ;;  %s347_s20 = scalar_lea.vmem %s935_s7, %s887_s19 }
  0xa0   : > { %v355_v2 = vpop.xlane.xlu0 %354 }
  0xa1   : > { %v357_v3 = vmul.f32 0.03125, %v355_v2 }
  0xa3   : > { %v358_v4 = vsub.f32 %v349_v0, %v357_v3 }
  0xa5   : > { %v359_v5 = vmul.f32 %v358_v4, %v358_v4 }
  0xa7   : > { %v360_v6 = vsel %vm352_vm0, %v359_v5, 0.0 }
  0xa8   : > { %361 = vadd.xlane.f32.xlu0 %v360_v6 }
 0x135   : > { %v362_v10 = vpop.xlane.xlu0 %361 }
 0x136   : > { %v363_v11 = vmul.f32 0.03125, %v362_v10 }
 0x138   : > { %v364_v12 = vadd.f32 1e-05, %v363_v11 }
 0x13a   : > { %765 = vrsqrt.f32 %v364_v12 }
 0x144   : > { %v766_v13 = vpop.eup %765 }
 0x145   : > { %v366_v15 = vmul.f32 %v766_v13, %v358_v4 }
 0x147   : > { %v373_v17 = vmul.f32 %v693_v14, %v366_v15 }
 0x149   : > { %v380_v18 = vadd.f32 %v694_v16, %v373_v17 }
 0x14b   : > { %v381_v19 = vpack.c.bf16 %v380_v18, %v380_v18 }
 0x14d   : > { %723 = vmatmul.mubr.msk.bf16.vlgmr.msra.gmra.mrb[0].mxu0 %vm352_vm0, %v381_v19 }
 0x220   : > { %v442_v21 = vpop.f32.mrb[0].mxu0 }
 0x221   : > { %v443_v22 = vadd.f32 %v695_v20, %v442_v21  ;;  %v724_v23 = vpop.f32.mrb[1].mxu0 }
 0x222   : > { %v445_v24 = vpop.f32.mrb[2].mxu0 }
 0x223   : > { %v448_v25 = vpack.c.bf16 %v443_v22, %v443_v22  ;;  %v725_v26 = vpop.f32.mrb[3].mxu0 }
 0x225   : > { %462 = vrot.lane.b32.xlu0 %v448_v25, %s793_s23  ;;  %454 = vrot.lane.b32.xlu1 %v448_v25, %s794_s28  ;;  %450 = vst.msk [vmem:[%s893_s22] sm:$0xf] %vm449_vm2, %v448_v25 }
 0x229   : > { %497 = vrot.lane.b32.xlu0 %v448_v25, %s795_s24  ;;  %458 = vrot.lane.b32.xlu1 %v448_v25, %s796_s29 }
 0x22d   : > { %467 = vrot.lane.b32.xlu1 %v448_v25, %s797_s30 }
 0x231   : > { %472 = vrot.lane.b32.xlu1 %v448_v25, %s798_s8 }
 0x235   : > { %477 = vrot.lane.b32.xlu1 %v448_v25, %s799_s9 }
 0x239   : > { %482 = vrot.lane.b32.xlu1 %v448_v25, %s800_s10 }
 0x23d   : > { %487 = vrot.lane.b32.xlu1 %v448_v25, %s801_s11 }
 0x241   : > { %492 = vrot.lane.b32.xlu1 %v448_v25, %s802_s12 }
 0x245   : > { %502 = vrot.lane.b32.xlu1 %v448_v25, %s803_s13 }
 0x297   : > { %v463_v27 = vpop.permute.xlu0 %462  ;;  %v455_v28 = vpop.permute.xlu1 %454 }
 0x298   : > { %700 = vst.msk [vmem:[%s893_s22 + $0x4] sm:$0xf] %vm449_vm2, %v463_v27  ;;  %457 = vst.msk [vmem:[%s339_s16] sm:$0xf] %vm449_vm2, %v455_v28 }
 0x29b   : > { %v498_v29 = vpop.permute.xlu0 %497  ;;  %v459_v30 = vpop.permute.xlu1 %458 }
 0x29c   : > { %707 = vst.msk [vmem:[%s339_s16 + $0xc] sm:$0xf] %vm449_vm2, %v498_v29  ;;  %461 = vst.msk [vmem:[%s347_s20] sm:$0xf] %vm449_vm2, %v459_v30 }
 0x29f   : > { %v468_v31 = vpop.permute.xlu1 %467 }
 0x2a0   : > { %701 = vst.msk [vmem:[%s339_s16 + $0x4] sm:$0xf] %vm449_vm2, %v468_v31 }
 0x2a3   : > { %v473_v32 = vpop.permute.xlu1 %472 }
 0x2a4   : > { %702 = vst.msk [vmem:[%s347_s20 + $0x4] sm:$0xf] %vm449_vm2, %v473_v32 }
 0x2a7   : > { %v478_v33 = vpop.permute.xlu1 %477 }
 0x2a8   : > { %703 = vst.msk [vmem:[%s893_s22 + $0x8] sm:$0xf] %vm449_vm2, %v478_v33 }
 0x2ab   : > { %v483_v34 = vpop.permute.xlu1 %482 }
 0x2ac   : > { %704 = vst.msk [vmem:[%s339_s16 + $0x8] sm:$0xf] %vm449_vm2, %v483_v34 }
 0x2af   : > { %v488_v35 = vpop.permute.xlu1 %487 }
 0x2b0   : > { %705 = vst.msk [vmem:[%s347_s20 + $0x8] sm:$0xf] %vm449_vm2, %v488_v35 }
 0x2b3   : > { %v493_v36 = vpop.permute.xlu1 %492 }
 0x2b4   : > { %706 = vst.msk [vmem:[%s893_s22 + $0xc] sm:$0xf] %vm449_vm2, %v493_v36 }
 0x2b7   : > { %v503_v37 = vpop.permute.xlu1 %502 }
 0x2b8   : > { %708 = vst.msk [vmem:[%s347_s20 + $0xc] sm:$0xf] %vm449_vm2, %v503_v37 }
 0x2b9 PF: > { %s18_s26 = sadd.s32 1, %s789_s26   ;;  %s936_s24 = smov %s785_s25 }
 0x2ba   : > { %p15_p5 = scmp.ge.s32.totalorder %s18_s26, 4   ;;  %s937_s25 = smov %s939_s27 }
 0x2bc   :  { %17 = sbr.rel (!%p15_p5) target bundleno = 2 (0x2), region = 103 }

// kernel: block_forward.4
= control target key start
LH: loop header
LB: loop body
LE: loop exit
PB: predicated region body
PF: predicated region fallthrough
CT: control target
= control target key end

     0   :  { %s1769_s12 = smov 0   ;;  %s1771_s13 = smov 0   ;;  %s1945_s0 = inlined_call_operand.vmem [shape: bf16[2,4,8,8], index: 0, kind: input, shape index: {}]   ;;  %s1946_s1 = inlined_call_operand.vmem [shape: bf16[2,4,8,8], index: 1, kind: input, shape index: {}]   ;;  %s1947_s2 = inlined_call_operand.vmem [shape: bf16[2,4,8,8], index: 2, kind: input, shape index: {}]   ;;  %s1948_s3 = inlined_call_operand.vmem [shape: bf16[2,8,32], index: 3, kind: output, shape index: {}]  }
   0x1   :  { %s1773_s14 = smov 0  }
   0x2 LB: > { %s32_s15 = sadd.s32 1, %s1736_s13  ;;  %p1562_p0 = scmp.ge.s32.totalorder %s1740_s14, 1  ;;  %s1740_s14 = sphi %s1773_s14, %s13_s14   ;;  %s1736_s13 = sphi %s1771_s13, %s1950_s13   ;;  %s1732_s12 = sphi %s1769_s12, %s1949_s12  }
   0x3   : > { %p34_p1 = scmp.ge.s32.totalorder %s32_s15, 2  ;;  %p209_p2 = scmp.lt.s32.totalorder %s1740_s14, 3 }
   0x5   : > { %s1952_s15 = smov (%p34_p1, %s32_s15), 0  ;;  %p210_p3 = pnand %p1562_p0, %p209_p2 }
   0x6   : > { %p258_p4 = scmp.lt.s32.totalorder (!%p210_p3), %s1732_s12, 1  ;;  %vm311_vm0 = vcmask (!%p210_p3), 64512   ;;  %v1742_v0 = vmov (!%p210_p3), 0.0   ;;  %vm1743_vm1 = vmmov (!%p210_p3), 0   ;;  %vm302_vm2 = vcmask (!%p210_p3), 7168   ;;  %s1746_s26 = smov (!%p210_p3), 8  }
   0x7   : > { %213 = sbr.rel (%p210_p3) target bundleno = 951 (0x3b7), region = 32  ;;  %1613 = vmatprep.subr.bf16.mxu0 (!%p210_p3), %v1742_v0  ;;  %312 = vst.msk [vmem:[#allocation4] sm:$0xff] (!%p210_p3), %vm311_vm0, %v1742_v0  ;;  %313 = vst.msk [vmem:[#allocation4 + $0x8] sm:$0xff] (!%p210_p3), %vm311_vm0, %v1742_v0  ;;  %1619 = vmatprep.subr.bf16.mxu1 (!%p210_p3), %v1742_v0  ;;  %v1744_v13 = vmov (!%p210_p3), -inf   ;;  %v1040_v14 = vlaneseq (!%p210_p3)  ;;  %v1745_v41 = vmov (!%p210_p3), 0   ;;  %vm1179_vm4 = vcmask (!%p210_p3), 1043456  }
   0x8   : > { %314 = vst.msk [vmem:[#allocation4 + $0x10] sm:$0xff] (!%p210_p3), %vm311_vm0, %v1742_v0  ;;  %315 = vst.msk [vmem:[#allocation4 + $0x18] sm:$0xff] (!%p210_p3), %vm311_vm0, %v1742_v0  ;;  %1615 = vmatprep.mubr.msk.bf16.mxu0 (!%p210_p3), %vm1743_vm1, %v1742_v0  ;;  %1621 = vmatprep.mubr.msk.bf16.mxu1 (!%p210_p3), %vm1743_vm1, %v1742_v0  ;;  %s1747_s27 = smov (!%p210_p3), 16   ;;  %s1748_s28 = smov (!%p210_p3), 24   ;;  %vm1413_vm5 = vcmask (!%p210_p3), 60416   ;;  %vm1422_vm6 = vcmask (!%p210_p3), 126016  }
   0x9   : > { %303 = vst.msk [vmem:[#allocation2] sm:$0xff] (!%p210_p3), %vm302_vm2, %v1744_v13  ;;  %304 = vst.msk [vmem:[#allocation2 + $0x8] sm:$0xff] (!%p210_p3), %vm302_vm2, %v1744_v13  ;;  %v1041_v15 = vshrl.u32 (!%p210_p3), %v1040_v14, 7  ;;  %v1043_v16 = vand.u32 (!%p210_p3), 127, %v1040_v14  ;;  %1692 = vset.pattern.permute.xlu0 (!%p210_p3), %v1745_v41  ;;  %1693 = vset.pattern.permute.xlu1 (!%p210_p3), %v1745_v41  ;;  %vm1431_vm7 = vcmask (!%p210_p3), 191616   ;;  %vm1440_vm8 = vcmask (!%p210_p3), 257216  }
   0xa   : > { %305 = vst.msk [vmem:[#allocation2 + $0x10] sm:$0xff] (!%p210_p3), %vm302_vm2, %v1744_v13  ;;  %306 = vst.msk [vmem:[#allocation2 + $0x18] sm:$0xff] (!%p210_p3), %vm302_vm2, %v1744_v13 }
   0xb   : > { %307 = vst.msk [vmem:[#allocation3] sm:$0xff] (!%p210_p3), %vm302_vm2, %v1742_v0  ;;  %308 = vst.msk [vmem:[#allocation3 + $0x8] sm:$0xff] (!%p210_p3), %vm302_vm2, %v1742_v0  ;;  %vm1044_vm3 = vcmp.ge.s32.totalorder (!%p210_p3), %v1041_v15, %v1043_v16 }
   0xc   : > { %309 = vst.msk [vmem:[#allocation3 + $0x10] sm:$0xff] (!%p210_p3), %vm302_vm2, %v1742_v0  ;;  %310 = vst.msk [vmem:[#allocation3 + $0x18] sm:$0xff] (!%p210_p3), %vm302_vm2, %v1742_v0 }
   0xe   : > { %s1954_s12 = smov (!%p258_p4, %s1732_s12), 1 }
   0xf   : > { %s1804_s16 = sshll.u32 %s1954_s12, 4  ;;  %s1569_s29 = sshll.u32 %s1954_s12, 2 }
  0x10   : > { %s275_s19 = scalar_lea.vmem %s1946_s1, %s1804_s16  ;;  %s265_s22 = scalar_lea.vmem %s1945_s0, %s1804_s16  ;;  %v1866_v42 = vld [vmem:[#allocation2] sm:$0xff]  ;;  %v1871_v45 = vld [vmem:[#allocation2 + $0x8] sm:$0xff] }
  0x11   : > { %v847_v1 = vld [vmem:[%s275_s19] sm:$0xf]  ;;  %v848_v2 = vld [vmem:[%s275_s19 + $0x4] sm:$0xf]  ;;  %v849_v5 = vld [vmem:[%s275_s19 + $0x8] sm:$0xf]  ;;  %s287_s25 = scalar_lea.vmem %s1947_s2, %s1804_s16  ;;  %s296_s5 = scalar_lea.vmem %s1948_s3, %s1569_s29 }
  0x12   : > { %v860_v3 = vsel %vm311_vm0, %v847_v1, 0  ;;  %v906_v4 = vsel %vm311_vm0, %v848_v2, 0  ;;  %v850_v6 = vld [vmem:[%s275_s19 + $0xc] sm:$0xf]  ;;  %v843_v7 = vld [vmem:[%s265_s22] sm:$0xf] }
  0x13   : > { %1614 = vmatpush3.bf16.xpose.msra.mxu0 %v860_v3  ;;  %1620 = vmatpush3.bf16.xpose.msra.mxu1 %v906_v4  ;;  %v844_v8 = vld [vmem:[%s265_s22 + $0x4] sm:$0xf]  ;;  %v952_v9 = vsel %vm311_vm0, %v849_v5, 0  ;;  %v998_v10 = vsel %vm311_vm0, %v850_v6, 0  ;;  %v845_v11 = vld [vmem:[%s265_s22 + $0x8] sm:$0xf] }
  0x14   : > { %1625 = vmatprep.subr.bf16.mxu0 %v1742_v0  ;;  %1631 = vmatprep.subr.bf16.mxu1 %v1742_v0  ;;  %v846_v12 = vld [vmem:[%s265_s22 + $0xc] sm:$0xf]  ;;  %v1881_v49 = vld [vmem:[#allocation2 + $0x10] sm:$0xff]  ;;  %v1889_v53 = vld [vmem:[#allocation2 + $0x18] sm:$0xff] }
  0x15   : > { %v851_v58 = vld [vmem:[%s287_s25] sm:$0xf]  ;;  %v852_v60 = vld [vmem:[%s287_s25 + $0x4] sm:$0xf]  ;;  %v853_v62 = vld [vmem:[%s287_s25 + $0x8] sm:$0xf] }
  0x16   : > { %v1181_v59 = vsel %vm1179_vm4, %v851_v58, 0  ;;  %v1227_v61 = vsel %vm1179_vm4, %v852_v60, 0  ;;  %v1273_v63 = vsel %vm1179_vm4, %v853_v62, 0  ;;  %v854_v1 = vld [vmem:[%s287_s25 + $0xc] sm:$0xf] }
  0x17   : > { %v1319_v2 = vsel %vm1179_vm4, %v854_v1, 0  ;;  %v1145_v58 = vld [vmem:[#allocation4 + $0x8] sm:$0xff] }
  0x1a   : > { %1616 = vmatmul.mubr.msk.bf16.vlgmr.msra.gmra.mrb[0].mxu0 %vm311_vm0, %v843_v7  ;;  %1622 = vmatmul.mubr.msk.bf16.vlgmr.msra.gmra.mrb[0].mxu1 %vm311_vm0, %v844_v8 }
  0x1b   : > { %1626 = vmatpush3.bf16.xpose.msra.mxu0 %v952_v9  ;;  %1632 = vmatpush3.bf16.xpose.msra.mxu1 %v998_v10 }
  0x1c   : > { %1627 = vmatprep.mubr.msk.bf16.mxu0 %vm1743_vm1, %v1742_v0  ;;  %1633 = vmatprep.mubr.msk.bf16.mxu1 %vm1743_vm1, %v1742_v0 }
  0x1d   : > { %1637 = vmatprep.subr.bf16.mxu0 %v1742_v0  ;;  %1643 = vmatprep.subr.bf16.mxu1 %v1742_v0 }
  0x22   : > { %1628 = vmatmul.mubr.msk.bf16.vlgmr.msra.gmra.mrb[4].mxu0 %vm311_vm0, %v845_v11  ;;  %1634 = vmatmul.mubr.msk.bf16.vlgmr.msra.gmra.mrb[4].mxu1 %vm311_vm0, %v846_v12 }
  0x23   : > { %1639 = vmatprep.mubr.msk.bf16.mxu0 %vm1743_vm1, %v1742_v0  ;;  %1645 = vmatprep.mubr.msk.bf16.mxu1 %vm1743_vm1, %v1742_v0 }
  0x24   : > { %1638 = vmatpush3.bf16.msra.mxu0 %v1181_v59  ;;  %1644 = vmatpush3.bf16.msra.mxu1 %v1227_v61 }
  0x25   : > { %1649 = vmatprep.subr.bf16.mxu0 %v1742_v0  ;;  %1655 = vmatprep.subr.bf16.mxu1 %v1742_v0 }
  0xed   : > { %v896_v17 = vpop.f32.mrb[0].mxu0  ;;  %v942_v18 = vpop.f32.mrb[0].mxu1 }
  0xee   : > { %v1847_v19 = vsel %vm1044_vm3, %v896_v17, -1e+30  ;;  %v1617_v20 = vpop.f32.mrb[1].mxu0  ;;  %v1850_v21 = vsel %vm1044_vm3, %v942_v18, -1e+30  ;;  %v1623_v22 = vpop.f32.mrb[1].mxu1 }
  0xef   : > { %v899_v23 = vpop.f32.mrb[2].mxu0  ;;  %v1055_v24 = vsel %vm311_vm0, %v1847_v19, -inf  ;;  %v945_v25 = vpop.f32.mrb[2].mxu1  ;;  %v1058_v28 = vsel %vm311_vm0, %v1850_v21, -inf }
  0xf0   : > { %1056 = vmax.xlane.f32.xlu0 %v1055_v24  ;;  %v1618_v26 = vpop.f32.mrb[3].mxu0  ;;  %v1624_v27 = vpop.f32.mrb[3].mxu1 }
  0xf4   : > { %1059 = vmax.xlane.f32.xlu0 %v1058_v28 }
  0xf5   : > { %v988_v29 = vpop.f32.mrb[4].mxu0  ;;  %v1034_v30 = vpop.f32.mrb[4].mxu1 }
  0xf6   : > { %v1857_v31 = vsel %vm1044_vm3, %v988_v29, -1e+30  ;;  %v1629_v32 = vpop.f32.mrb[5].mxu0  ;;  %v1860_v33 = vsel %vm1044_vm3, %v1034_v30, -1e+30  ;;  %v1635_v34 = vpop.f32.mrb[5].mxu1 }
  0xf7   : > { %v991_v35 = vpop.f32.mrb[6].mxu0  ;;  %v1061_v36 = vsel %vm311_vm0, %v1857_v31, -inf  ;;  %v1037_v37 = vpop.f32.mrb[6].mxu1  ;;  %v1064_v40 = vsel %vm311_vm0, %v1860_v33, -inf }
  0xf8   : > { %1062 = vmax.xlane.f32.xlu1 %v1061_v36  ;;  %v1630_v38 = vpop.f32.mrb[7].mxu0  ;;  %v1636_v39 = vpop.f32.mrb[7].mxu1  ;;  %v1117_v36 = vld [vmem:[#allocation3 + $0x10] sm:$0xff] }
  0xfc   : > { %1065 = vmax.xlane.f32.xlu1 %v1064_v40  ;;  %v1118_v40 = vld [vmem:[#allocation3 + $0x18] sm:$0xff] }
 0x17d   : > { %v1057_v43 = vpop.xlane.xlu0 %1056 }
 0x17e   : > { %v1869_v44 = vmax.f32 %v1866_v42, %v1057_v43 }
 0x180   : > { %v1071_v46 = vsub.f32 %v1866_v42, %v1869_v44  ;;  %1369 = vst.msk [vmem:[#allocation2] sm:$0xff] %vm302_vm2, %v1869_v44  ;;  %1085 = vperm.xlu0 %1692, %v1869_v44  }
 0x181   : > { %v1060_v47 = vpop.xlane.xlu0 %1059 }
 0x182   : > { %v1879_v48 = vmax.f32 %v1871_v45, %v1060_v47  ;;  %v1075_v32 = vmul.f32 1.442695, %v1071_v46 }
 0x184   : > { %v1072_v50 = vsub.f32 %v1871_v45, %v1879_v48  ;;  %1370 = vst.msk [vmem:[#allocation2 + $0x8] sm:$0xff] %vm302_vm2, %v1879_v48  ;;  %1090 = vperm.xlu1 %1693, %v1879_v48   ;;  %v1115_v48 = vld [vmem:[#allocation3] sm:$0xff] }
 0x185   : > { %v1063_v51 = vpop.xlane.xlu1 %1062 }
 0x186   : > { %v1069_v52 = vmax.f32 %v1881_v49, %v1063_v51 }
 0x188   : > { %v1073_v54 = vsub.f32 %v1881_v49, %v1069_v52  ;;  %1371 = vst.msk [vmem:[#allocation2 + $0x10] sm:$0xff] %vm302_vm2, %v1069_v52  ;;  %1095 = vperm.xlu1 %1693, %v1069_v52  }
 0x189   : > { %v1066_v55 = vpop.xlane.xlu1 %1065 }
 0x18a   : > { %v1070_v56 = vmax.f32 %v1889_v53, %v1066_v55  ;;  %v1079_v26 = vmul.f32 1.442695, %v1073_v54 }
 0x18c   : > { %v1074_v57 = vsub.f32 %v1889_v53, %v1070_v56  ;;  %1372 = vst.msk [vmem:[#allocation2 + $0x18] sm:$0xff] %vm302_vm2, %v1070_v56  ;;  %1100 = vperm.xlu1 %1693, %v1070_v56  }
 0x18e   : > { %v1081_v28 = vmul.f32 1.442695, %v1074_v57 }
 0x1ff   : > { %v1086_v3 = vpop.permute.xlu0 %1085 }
 0x200   : > { %v1103_v4 = vsub.f32 %v1847_v19, %v1086_v3 }
 0x202   : > { %v1107_v5 = vmul.f32 1.442695, %v1103_v4 }
 0x203   : > { %v1091_v6 = vpop.permute.xlu1 %1090 }
 0x204   : > { %1694 = vpow2.f32 %v1107_v5  ;;  %v1104_v7 = vsub.f32 %v1850_v21, %v1091_v6 }
 0x206   : > { %v1109_v8 = vmul.f32 1.442695, %v1104_v7 }
 0x207   : > { %v1096_v9 = vpop.permute.xlu1 %1095 }
 0x208   : > { %1696 = vpow2.f32 %v1109_v8  ;;  %v1105_v10 = vsub.f32 %v1857_v31, %v1096_v9 }
 0x20a   : > { %v1111_v11 = vmul.f32 1.442695, %v1105_v10  ;;  %v1147_v10 = vld [vmem:[#allocation4 + $0x18] sm:$0xff] }
 0x20b   : > { %v1101_v12 = vpop.permute.xlu1 %1100 }
 0x20c   : > { %1698 = vpow2.f32 %v1111_v11  ;;  %v1106_v13 = vsub.f32 %v1860_v33, %v1101_v12  ;;  %v1116_v33 = vld [vmem:[#allocation3 + $0x8] sm:$0xff] }
 0x20e   : > { %v1695_v14 = vpop.eup %1694  ;;  %v1113_v15 = vmul.f32 1.442695, %v1106_v13 }
 0x20f   : > { %v1172_v16 = vpack.c.bf16 %v1695_v14, %v1695_v14  ;;  %v1123_v27 = vsel %vm311_vm0, %v1695_v14, 0.0 }
 0x210   : > { %1700 = vpow2.f32 %v1113_v15 }
 0x211   : > { %1640 = vmatmul.mubr.msk.bf16.vlgmr.msra.gmra.mrb[8].mxu0 %vm311_vm0, %v1172_v16  ;;  %1702 = vpow2.f32 %v1079_v26 }
 0x212   : > { %v1697_v17 = vpop.eup %1696  ;;  %1650 = vmatpush3.bf16.msra.mxu0 %v1273_v63  ;;  %1651 = vmatprep.mubr.msk.bf16.mxu0 %vm1743_vm1, %v1742_v0 }
 0x213   : > { %v1126_v18 = vsel %vm311_vm0, %v1697_v17, 0.0  ;;  %v1173_v19 = vpack.c.bf16 %v1697_v17, %v1697_v17 }
 0x214   : > { %1127 = vadd.xlane.f32.xlu1 %v1126_v18 }
 0x215   : > { %1646 = vmatmul.mubr.msk.bf16.vlgmr.msra.gmra.mrb[8].mxu1 %vm311_vm0, %v1173_v19 }
 0x216   : > { %v1699_v20 = vpop.eup %1698  ;;  %1656 = vmatpush3.bf16.msra.mxu1 %v1319_v2  ;;  %1657 = vmatprep.mubr.msk.bf16.mxu1 %vm1743_vm1, %v1742_v0  ;;  %v1077_v0 = vmul.f32 1.442695, %v1072_v50  ;;  %v1146_v2 = vld [vmem:[#allocation4 + $0x10] sm:$0xff] }
 0x217   : > { %v1129_v21 = vsel %vm311_vm0, %v1699_v20, 0.0  ;;  %v1174_v22 = vpack.c.bf16 %v1699_v20, %v1699_v20 }
 0x218   : > { %1130 = vadd.xlane.f32.xlu0 %v1129_v21  ;;  %1704 = vpow2.f32 %v1077_v0 }
 0x219   : > { %1652 = vmatmul.mubr.msk.bf16.vlgmr.msra.gmra.mrb[12].mxu0 %vm311_vm0, %v1174_v22  ;;  %1706 = vpow2.f32 %v1081_v28 }
 0x21a   : > { %v1701_v23 = vpop.eup %1700  ;;  %1708 = vpow2.f32 %v1075_v32 }
 0x21b   : > { %v1132_v24 = vsel %vm311_vm0, %v1701_v23, 0.0  ;;  %v1175_v25 = vpack.c.bf16 %v1701_v23, %v1701_v23  ;;  %v1703_v29 = vpop.eup %1702 }
 0x21c   : > { %1133 = vadd.xlane.f32.xlu1 %v1132_v24  ;;  %v1121_v38 = vmul.f32 %v1703_v29, %v1117_v36 }
 0x21d   : > { %1658 = vmatmul.mubr.msk.bf16.vlgmr.msra.gmra.mrb[12].mxu1 %vm311_vm0, %v1175_v25 }
 0x220   : > { %1124 = vadd.xlane.f32.xlu1 %v1123_v27 }
 0x222   : > { %v1705_v30 = vpop.eup %1704 }
 0x223   : > { %v1707_v31 = vpop.eup %1706  ;;  %v1120_v34 = vmul.f32 %v1705_v30, %v1116_v33 }
 0x224   : > { %v1122_v43 = vmul.f32 %v1707_v31, %v1118_v40  ;;  %v1709_v45 = vpop.eup %1708 }
 0x225   : > { %v1119_v46 = vmul.f32 %v1709_v45, %v1115_v48 }
 0x22e   : > { %1160 = vperm.xlu0 %1692, %v1703_v29   ;;  %v1144_v29 = vld [vmem:[#allocation4] sm:$0xff] }
 0x231   : > { %1155 = vperm.xlu1 %1693, %v1705_v30  }
 0x235   : > { %1165 = vperm.xlu1 %1693, %v1707_v31  }
 0x2a1   : > { %v1128_v35 = vpop.xlane.xlu1 %1127 }
 0x2a2   : > { %v1136_v37 = vadd.f32 %v1128_v35, %v1120_v34 }
 0x2a4   : > { %1141 = vst.msk [vmem:[#allocation3 + $0x8] sm:$0xff] %vm302_vm2, %v1136_v37 }
 0x2a5   : > { %v1131_v39 = vpop.xlane.xlu0 %1130 }
 0x2a6   : > { %v1137_v41 = vadd.f32 %v1131_v39, %v1121_v38 }
 0x2a8   : > { %1142 = vst.msk [vmem:[#allocation3 + $0x10] sm:$0xff] %vm302_vm2, %v1137_v41 }
 0x2a9   : > { %v1134_v47 = vpop.xlane.xlu1 %1133 }
 0x2aa   : > { %v1138_v42 = vadd.f32 %v1134_v47, %v1122_v43 }
 0x2ab   : > { %v1377_v44 = vld [vmem:[#allocation3 + $0x8] sm:$0xff] }
 0x2ac   : > { %1143 = vst.msk [vmem:[#allocation3 + $0x18] sm:$0xff] %vm302_vm2, %v1138_v42  ;;  %1710 = vrcp.f32 %v1377_v44 }
 0x2ad   : > { %v1125_v49 = vpop.xlane.xlu1 %1124  ;;  %v1161_v3 = vpop.permute.xlu0 %1160 }
 0x2ae   : > { %v1135_v50 = vadd.f32 %v1125_v49, %v1119_v46  ;;  %v1170_v8 = vmul.f32 %v1161_v3, %v1146_v2 }
 0x2af   : > { %v1378_v51 = vld [vmem:[#allocation3 + $0x10] sm:$0xff] }
 0x2b0   : > { %1140 = vst.msk [vmem:[#allocation3] sm:$0xff] %vm302_vm2, %v1135_v50  ;;  %1712 = vrcp.f32 %v1378_v51 }
 0x2b1   : > { %v1156_v59 = vpop.permute.xlu1 %1155 }
 0x2b2   : > { %v1169_v63 = vmul.f32 %v1156_v59, %v1145_v58 }
 0x2b3   : > { %v1379_v52 = vld [vmem:[#allocation3 + $0x18] sm:$0xff] }
 0x2b4   : > { %1714 = vrcp.f32 %v1379_v52 }
 0x2b5   : > { %v1166_v11 = vpop.permute.xlu1 %1165 }
 0x2b6   : > { %v1711_v53 = vpop.eup %1710  ;;  %v1171_v16 = vmul.f32 %v1166_v11, %v1147_v10 }
 0x2b7   : > { %1395 = vperm.xlu1 %1693, %v1711_v53   ;;  %v1376_v54 = vld [vmem:[#allocation3] sm:$0xff] }
 0x2b8   : > { %1716 = vrcp.f32 %v1376_v54 }
 0x2ba   : > { %v1713_v55 = vpop.eup %1712 }
 0x2bb   : > { %1400 = vperm.xlu1 %1693, %v1713_v55  }
 0x2be   : > { %v1715_v56 = vpop.eup %1714 }
 0x2bf   : > { %1150 = vperm.xlu1 %1693, %v1709_v45   ;;  %1405 = vperm.xlu0 %1692, %v1715_v56  }
 0x2c2   : > { %v1717_v57 = vpop.eup %1716 }
 0x2c3   : > { %1390 = vperm.xlu0 %1692, %v1717_v57  }
 0x2e4   : > { %v1217_v60 = vpop.f32.mrb[8].mxu0 }
 0x2e5   : > { %v1641_v61 = vpop.f32.mrb[9].mxu0 }
 0x2e6   : > { %v1220_v62 = vpop.f32.mrb[10].mxu0 }
 0x2e7   : > { %v1642_v1 = vpop.f32.mrb[11].mxu0 }
 0x2e8   : > { %v1263_v4 = vpop.f32.mrb[8].mxu1 }
 0x2e9   : > { %v1362_v5 = vadd.f32 %v1263_v4, %v1169_v63  ;;  %v1647_v6 = vpop.f32.mrb[9].mxu1 }
 0x2ea   : > { %v1266_v7 = vpop.f32.mrb[10].mxu1 }
 0x2eb   : > { %1366 = vst.msk [vmem:[#allocation4 + $0x8] sm:$0xff] %vm311_vm0, %v1362_v5  ;;  %v1648_v9 = vpop.f32.mrb[11].mxu1 }
 0x2ec   : > { %v1309_v12 = vpop.f32.mrb[12].mxu0 }
 0x2ed   : > { %v1363_v13 = vadd.f32 %v1309_v12, %v1170_v8  ;;  %v1653_v14 = vpop.f32.mrb[13].mxu0 }
 0x2ee   : > { %v1312_v15 = vpop.f32.mrb[14].mxu0 }
 0x2ef   : > { %1367 = vst.msk [vmem:[#allocation4 + $0x10] sm:$0xff] %vm311_vm0, %v1363_v13  ;;  %v1654_v17 = vpop.f32.mrb[15].mxu0 }
 0x2f0   : > { %v1355_v18 = vpop.f32.mrb[12].mxu1 }
 0x2f1   : > { %v1364_v19 = vadd.f32 %v1355_v18, %v1171_v16  ;;  %v1659_v20 = vpop.f32.mrb[13].mxu1 }
 0x2f2   : > { %v1358_v21 = vpop.f32.mrb[14].mxu1  ;;  %v1385_v23 = vld [vmem:[#allocation4 + $0x8] sm:$0xff] }
 0x2f3   : > { %1368 = vst.msk [vmem:[#allocation4 + $0x18] sm:$0xff] %vm311_vm0, %v1364_v19  ;;  %v1660_v22 = vpop.f32.mrb[15].mxu1 }
 0x2f6   : > { %v1386_v0 = vld [vmem:[#allocation4 + $0x10] sm:$0xff] }
 0x2fa   : > { %v1387_v32 = vld [vmem:[#allocation4 + $0x18] sm:$0xff] }
 0x336   : > { %v1396_v24 = vpop.permute.xlu1 %1395 }
 0x337   : > { %v1409_v25 = vmul.f32 %v1396_v24, %v1385_v23 }
 0x339   : > { %v1594_v26 = vpack.c.bf16 %v1409_v25, %v1409_v25 }
 0x33a   : > { %v1401_v27 = vpop.permute.xlu1 %1400 }
 0x33b   : > { %v1410_v28 = vmul.f32 %v1401_v27, %v1386_v0  ;;  %1419 = vrot.lane.b32.xlu1 %v1594_v26, %s1746_s26 }
 0x33d   : > { %v1595_v30 = vpack.c.bf16 %v1410_v28, %v1410_v28 }
 0x33e   : > { %v1406_v31 = vpop.permute.xlu0 %1405  ;;  %v1151_v33 = vpop.permute.xlu1 %1150 }
 0x33f   : > { %v1411_v34 = vmul.f32 %v1406_v31, %v1387_v32  ;;  %v1168_v35 = vmul.f32 %v1151_v33, %v1144_v29  ;;  %1428 = vrot.lane.b32.xlu0 %v1595_v30, %s1747_s27 }
 0x341   : > { %v1596_v36 = vpack.c.bf16 %v1411_v34, %v1411_v34  ;;  %v1361_v37 = vadd.f32 %v1217_v60, %v1168_v35 }
 0x342   : > { %v1391_v38 = vpop.permute.xlu0 %1390 }
 0x343   : > { %1365 = vst.msk [vmem:[#allocation4] sm:$0xff] %vm311_vm0, %v1361_v37  ;;  %1437 = vrot.lane.b32.xlu1 %v1596_v36, %s1748_s28 }
 0x34a   : > { %v1384_v39 = vld [vmem:[#allocation4] sm:$0xff] }
 0x34b   : > { %v1408_v40 = vmul.f32 %v1391_v38, %v1384_v39 }
 0x34d   : > { %v1412_v41 = vpack.c.bf16 %v1408_v40, %v1408_v40 }
 0x34f   : > { %1414 = vst.msk [vmem:[%s296_s5] sm:$0xf] %vm1413_vm5, %v1412_v41 }
 0x3ad   : > { %v1420_v43 = vpop.permute.xlu1 %1419 }
 0x3ae   : > { %1423 = vst.msk [vmem:[%s296_s5] sm:$0xf] %vm1422_vm6, %v1420_v43 }
 0x3b1   : > { %v1429_v45 = vpop.permute.xlu0 %1428 }
 0x3b2   : > { %1432 = vst.msk [vmem:[%s296_s5] sm:$0xf] %vm1431_vm7, %v1429_v45 }
 0x3b5   : > { %v1438_v47 = vpop.permute.xlu1 %1437 }
 0x3b6   : > { %1441 = vst.msk [vmem:[%s296_s5] sm:$0xf] %vm1440_vm8, %v1438_v47 }
 0x3b7 PF: > { %s13_s14 = sadd.s32 1, %s1740_s14   ;;  %s1949_s12 = smov %s1736_s13 }
 0x3b8   : > { %p10_p5 = scmp.ge.s32.totalorder %s13_s14, 4   ;;  %s1950_s13 = smov %s1952_s15 }
 0x3ba   :  { %12 = sbr.rel (!%p10_p5) target bundleno = 2 (0x2), region = 84 }

// kernel: block_forward.5
= control target key start
LH: loop header
LB: loop body
LE: loop exit
PB: predicated region body
PF: predicated region fallthrough
CT: control target
= control target key end

     0   :  { %14 = vsyncpa [#allocation5], 0  ;;  %s1325_s0 = inlined_call_operand.vmem [shape: bf16[2,8,32], index: 0, kind: input, shape index: {}]   ;;  %s1326_s1 = inlined_call_operand.vmem [shape: bf16[32,32], index: 1, kind: input, shape index: {}]   ;;  %s1327_s2 = inlined_call_operand.vmem [shape: f32[1,32], index: 2, kind: input, shape index: {}]   ;;  %s1328_s3 = inlined_call_operand.vmem [shape: f32[1,32], index: 3, kind: input, shape index: {}]   ;;  %s1329_s4 = inlined_call_operand.vmem [shape: f32[1,32], index: 4, kind: input, shape index: {}]   ;;  %s1330_s5 = inlined_call_operand.vmem [shape: bf16[32,128], index: 5, kind: input, shape index: {}]   ;;  %s1331_s6 = inlined_call_operand.vmem [shape: f32[1,128], index: 6, kind: input, shape index: {}]   ;;  %s1332_s7 = inlined_call_operand.vmem [shape: bf16[128,32], index: 7, kind: input, shape index: {}]   ;;  %s1333_s8 = inlined_call_operand.vmem [shape: f32[1,32], index: 8, kind: input, shape index: {}]   ;;  %s1334_s9 = inlined_call_operand.hbm [shape: f32[2,8,32], index: 9, kind: output, shape index: {}]  }
   0x1   :  { %16 = vsyncpa [#allocation5 + $0x1], 0  ;;  %s1139_s30 = smov 0   ;;  %s1141_s10 = smov 0  }
   0x2   :  { %s1143_s11 = smov 0   ;;  %s1145_s12 = smov 0  }
   0x3   :  { %s1147_s13 = smov 0   ;;  %s1149_s14 = smov 0  }
   0x4 LB: > { %s849_s15 = sadd.s32 4294967295, %s1084_s14   ;;  %s850_s16 = sadd.s32 4294967294, %s1084_s14   ;;  %s1084_s14 = sphi %s1149_s14, %s22_s14   ;;  %s1080_s13 = sphi %s1147_s13, %s1341_s13   ;;  %s1076_s12 = sphi %s1145_s12, %s1340_s12   ;;  %s1072_s11 = sphi %s1143_s11, %s1339_s11   ;;  %s1068_s10 = sphi %s1141_s10, %s1338_s10   ;;  %s1064_s30 = sphi %s1139_s30, %s1337_s30  }
   0x5   : > { %s41_s17 = sadd.s32 1, %s1080_s13  ;;  %s261_s18 = sadd.s32 1, %s1072_s11 }
   0x6   : > { %p43_p0 = scmp.ge.s32.totalorder %s41_s17, 2  ;;  %p271_p1 = scmp.ne.s32.totalorder %s1072_s11, %s1068_s10 }
   0x7   : > { %p272_p2 = scmp.eq.s32.totalorder %s849_s15, 1  ;;  %p277_p3 = scmp.ne.s32.totalorder %s1068_s10, %s1064_s30 }
   0x8   : > { %s1343_s17 = smov (%p43_p0, %s41_s17), 0  ;;  %p278_p5 = scmp.eq.s32.totalorder %s850_s16, 1 }
   0x9   : > { %p1179_p4 = por %p272_p2, %p271_p1  ;;  %s256_s20 = ssub.s32 %s1080_s13, %s1343_s17 }
   0xa   : > { %p856_p6 = scmp.ge.s32.totalorder %s1084_s14, 1  ;;  %p259_p7 = scmp.eq.s32.totalorder %s256_s20, 0 }
   0xb   : > { %p1186_p8 = por %p278_p5, %p277_p3  ;;  %p343_p9 = scmp.lt.s32.totalorder %s1084_s14, 3 }
   0xc   : > { %s1192_s22 = scalar_select %p259_p7, %s1072_s11, %s261_s18  }
   0xd   : > { %p344_p10 = pnand %p856_p6, %p343_p9 }
   0xe   : > { %v990_v0 = vld [vmem:[%s1326_s1] sm:$0xff] (!%p344_p10)   ;;  %v1086_v1 = vmov (!%p344_p10), 0.0   ;;  %v991_v2 = vld [vmem:[%s1326_s1 + $0x8] sm:$0xff] (!%p344_p10)   ;;  %vm1087_vm0 = vmmov (!%p344_p10), 0   ;;  %p393_p11 = scmp.lt.s32.totalorder (!%p344_p10), %s1076_s12, 1  ;;  %vm442_vm1 = vcmask (!%p344_p10), 261120  }
   0xf   : > { %347 = sbr.rel (%p344_p10) target bundleno = 1043 (0x413), region = 56  ;;  %897 = vmatprep.subr.bf16.mxu1 (!%p344_p10), %v1086_v1  ;;  %913 = vmatprep.subr.bf16.mxu0 (!%p344_p10), %v1086_v1  ;;  %519 = vst.msk [vmem:[#allocation3] sm:$0xff] (!%p344_p10), %vm442_vm1, %v1086_v1  ;;  %v859_v4 = vld [vmem:[%s1327_s2] ss:$0 sm:$0xff] (!%p344_p10)  ;;  %v993_v17 = vld [vmem:[%s1330_s5 + $0x8] sm:$0xff] (!%p344_p10)   ;;  %vm517_vm2 = vcmask (!%p344_p10), 257024  }
  0x10   : > { %898 = vmatpush3.bf16.msra.mxu1 (!%p344_p10), %v990_v0  ;;  %901 = vmatprep.mubr.msk.bf16.mxu1 (!%p344_p10), %vm1087_vm0, %v1086_v1  ;;  %v992_v16 = vld [vmem:[%s1330_s5] sm:$0xff] (!%p344_p10)   ;;  %v995_v30 = vld [vmem:[%s1332_s7 + $0x8] sm:$0xff] (!%p344_p10)   ;;  %v996_v31 = vld [vmem:[%s1332_s7 + $0x10] sm:$0xff] (!%p344_p10)  }
  0x11   : > { %899 = vmatprep.subr.bf16.mxu1 (!%p344_p10), %v1086_v1  ;;  %929 = vmatprep.mubr.msk.bf16.mxu0 (!%p344_p10), %vm1087_vm0, %v1086_v1  ;;  %v994_v18 = vld [vmem:[%s1332_s7] sm:$0xff] (!%p344_p10)   ;;  %v997_v32 = vld [vmem:[%s1332_s7 + $0x18] sm:$0xff] (!%p344_p10)   ;;  %v999_v34 = vld [vmem:[%s1332_s7 + $0x28] sm:$0xff] (!%p344_p10)  }
  0x12   : > { %914 = vmatpush3.bf16.msra.mxu0 (!%p344_p10), %v994_v18  ;;  %v863_v23 = vld [vmem:[%s1328_s3] ss:$0 sm:$0xff] (!%p344_p10)  ;;  %v1000_v35 = vld [vmem:[%s1332_s7 + $0x30] sm:$0xff] (!%p344_p10)   ;;  %v1001_v36 = vld [vmem:[%s1332_s7 + $0x38] sm:$0xff] (!%p344_p10)  }
  0x13   : > { %915 = vmatprep.subr.bf16.mxu0 (!%p344_p10), %v1086_v1  ;;  %v864_v25 = vld [vmem:[%s1329_s4] ss:$0 sm:$0xff] (!%p344_p10) }
  0x14   : > { %900 = vmatpush3.bf16.msra.mxu1 (!%p344_p10), %v991_v2  ;;  %v998_v33 = vld [vmem:[%s1332_s7 + $0x20] sm:$0xff] (!%p344_p10)  }
  0x15   : > { %905 = vmatprep.subr.bf16.mxu1 (!%p344_p10), %v1086_v1  ;;  %v865_v37 = vld [vmem:[%s1331_s6] ss:$0 sm:$0xff] (!%p344_p10) }
  0x16   : > { %s394_s27 = scalar_select %p393_p11, %s1076_s12, 1  ;;  %916 = vmatpush3.bf16.msra.mxu0 %v995_v30  ;;  %v598_v53 = vld [vmem:[#allocation3] sm:$0xff]  ;;  %v877_v59 = vld [vmem:[%s1333_s8] ss:$0 sm:$0xff] }
  0x17   : > { %917 = vmatprep.subr.bf16.mxu0 %v1086_v1 }
  0x18   : > { %s858_s28 = sshll.u32 %s394_s27, 2  ;;  %s390_s27 = sand.u32 1, %s1068_s10  }
  0x19   : > { %s399_s16 = scalar_lea.vmem %s1325_s0, %s858_s28  ;;  %s857_s28 = sshll.u32 %s390_s27, 3 }
  0x1a   : > { %v418_v3 = vld [vmem:[%s399_s16] sm:$0xf]  ;;  %918 = vmatpush3.bf16.msra.mxu0 %v996_v31  ;;  %s879_s16 = sshll.u32 %s1076_s12, 7  ;;  %s392_s18 = scalar_lea.vmem [#allocation4], %s857_s28 }
  0x1b   : > { %902 = vmatmul.mubr.msk.bf16.vlgmr.msra.gmra.mrb[0].mxu1 %vm442_vm1, %v418_v3  ;;  %919 = vmatprep.subr.bf16.mxu0 %v1086_v1  ;;  %s733_s20 = sshll.u32 %s392_s18, 4  ;;  %s1277_s25 = scalar_lea.hbm %s1334_s9, %s879_s16  ;;  %s1279_s20 = int_to_ptr.vmem [resolvable:$true] %s733_s20 }
  0x1c   : > { %909 = vmatprep.mubr.msk.bf16.mxu1 %vm1087_vm0, %v1086_v1  ;;  %906 = vmatpush3.bf16.msra.mxu1 %v992_v16  ;;  %s719_s26 = scalar_lea.sflag [#allocation5], %s390_s27  ;;  %s1006_s29 = scalar_lea.vmem %s1279_s20, 128 }
  0x1d   : > { %907 = vmatprep.subr.bf16.mxu1 %v1086_v1  ;;  %p1007_p12 = scmp.ne.s32.totalorder %s1279_s20, %s1006_s29  ;;  %s1088_s12 = smov [#allocation4]  }
  0x1e   : > { %920 = vmatpush3.bf16.msra.mxu0 %v997_v32  ;;  %s1010_s28 = sshll.u32 %s1088_s12, 4  ;;  %s1011_s28 = int_to_ptr.vmem [resolvable:$false] %s1010_s28 }
  0x1f   : > { %921 = vmatprep.subr.bf16.mxu0 %v1086_v1  ;;  %p1008_p13 = pnand %p1007_p12, %p1179_p4  ;;  %s1012_s15 = scalar_lea.vmem %s1011_s28, 256 }
  0x20   : > { %908 = vmatpush3.bf16.msra.mxu1 %v993_v17  ;;  %p1013_p1 = scmp.lt.s32.totalorder %s1279_s20, %s1011_s28  ;;  %p1014_p2 = scmp.lt.s32.totalorder %s1012_s15, %s1006_s29 }
  0x21   : > { %p1009_p0 = pneg %p1008_p13 }
  0x22   : > { %922 = vmatpush3.bf16.msra.mxu0 %v998_v33  ;;  %p1015_p3 = por %p1014_p2, %p1013_p1 }
  0x23   : > { %923 = vmatprep.subr.bf16.mxu0 %v1086_v1 }
  0x24   : > { %p1016_p5 = pnand %p1015_p3, %p1009_p0 }
  0x26   : > { %924 = vmatpush3.bf16.msra.mxu0 %v999_v34 }
  0x27   : > { %925 = vmatprep.subr.bf16.mxu0 %v1086_v1 }
  0x2a   : > { %926 = vmatpush3.bf16.msra.mxu0 %v1000_v35 }
  0x2b   : > { %927 = vmatprep.subr.bf16.mxu0 %v1086_v1 }
  0x2e   : > { %928 = vmatpush3.bf16.msra.mxu0 %v1001_v36 }
  0xee   : > { %v480_v5 = vpop.f32.mrb[0].mxu1 }
  0xef   : > { %v481_v6 = vadd.f32 %v859_v4, %v480_v5  ;;  %v903_v7 = vpop.f32.mrb[1].mxu1 }
  0xf0   : > { %v483_v8 = vpop.f32.mrb[2].mxu1 }
  0xf1   : > { %v904_v9 = vpop.f32.mrb[3].mxu1  ;;  %v488_v10 = vsel %vm442_vm1, %v481_v6, 0.0 }
  0xf2   : > { %489 = vadd.xlane.f32.xlu0 %v488_v10 }
 0x17f   : > { %v490_v11 = vpop.xlane.xlu0 %489 }
 0x180   : > { %v492_v12 = vmul.f32 0.03125, %v490_v11 }
 0x182   : > { %v493_v13 = vsub.f32 %v481_v6, %v492_v12 }
 0x184   : > { %v494_v14 = vmul.f32 %v493_v13, %v493_v13 }
 0x186   : > { %v495_v15 = vsel %vm442_vm1, %v494_v14, 0.0 }
 0x187   : > { %496 = vadd.xlane.f32.xlu0 %v495_v15 }
 0x214   : > { %v497_v19 = vpop.xlane.xlu0 %496 }
 0x215   : > { %v498_v20 = vmul.f32 0.03125, %v497_v19 }
 0x217   : > { %v499_v21 = vadd.f32 1e-05, %v498_v20 }
 0x219   : > { %1002 = vrsqrt.f32 %v499_v21 }
 0x223   : > { %v1003_v22 = vpop.eup %1002 }
 0x224   : > { %v501_v24 = vmul.f32 %v1003_v22, %v493_v13 }
 0x226   : > { %v508_v26 = vmul.f32 %v863_v23, %v501_v24 }
 0x228   : > { %v515_v27 = vadd.f32 %v864_v25, %v508_v26 }
 0x22a   : > { %v516_v28 = vpack.c.bf16 %v515_v27, %v515_v27 }
 0x22c   : > { %518 = vst.msk [vmem:[#allocation2] sm:$0xf] %vm517_vm2, %v516_v28 }
 0x233   : > { %v520_v29 = vld [vmem:[#allocation2] sm:$0xf] }
 0x234   : > { %910 = vmatmul.mubr.msk.bf16.vlgmr.msra.gmra.mrb[4].mxu1 %vm442_vm1, %v520_v29 }
 0x307   : > { %v582_v38 = vpop.f32.mrb[4].mxu1 }
 0x308   : > { %v583_v39 = vadd.f32 %v865_v37, %v582_v38  ;;  %v911_v40 = vpop.f32.mrb[5].mxu1 }
 0x309   : > { %v585_v41 = vpop.f32.mrb[6].mxu1 }
 0x30a   : > { %v589_v42 = vmul.f32 0.044715, %v583_v39  ;;  %v912_v43 = vpop.f32.mrb[7].mxu1  ;;  %v588_v49 = vmul.f32 0.5, %v583_v39 }
 0x30c   : > { %v590_v44 = vmul.f32 %v589_v42, %v583_v39 }
 0x30e   : > { %v591_v45 = vmul.f32 %v590_v44, %v583_v39 }
 0x310   : > { %v592_v46 = vadd.f32 %v591_v45, %v583_v39 }
 0x312   : > { %v593_v47 = vmul.f32 0.7978846, %v592_v46 }
 0x314   : > { %1004 = vtanh.f32 %v593_v47 }
 0x31e   : > { %v1005_v48 = vpop.eup %1004 }
 0x31f   : > { %v595_v50 = vadd.f32 1.0, %v1005_v48 }
 0x321   : > { %v596_v51 = vmul.f32 %v595_v50, %v588_v49 }
 0x323   : > { %v597_v52 = vpack.c.bf16 %v596_v51, %v596_v51 }
 0x325   : > { %930 = vmatmul.mubr.bf16.vlgmr.msra.gmra.mrb[0].mxu0 %v597_v52 }
 0x3f8   : > { %v697_v54 = vpop.f32.mrb[0].mxu0 }
 0x3f9   : > { %v703_v55 = vadd.f32 %v697_v54, %v598_v53  ;;  %v931_v56 = vpop.f32.mrb[1].mxu0 }
 0x3fa   : > { %v700_v57 = vpop.f32.mrb[2].mxu0 }
 0x3fb   : > { %704 = vst.msk [vmem:[#allocation3] sm:$0xff] %vm442_vm1, %v703_v55  ;;  %v932_v58 = vpop.f32.mrb[3].mxu0 }
 0x402   : > { %v708_v60 = vld [vmem:[#allocation3] sm:$0xff] }
 0x403   : > { %v716_v61 = vadd.f32 %v877_v59, %v708_v60 }
 0x405   : > { %717 = vst.msk [vmem:[%s392_s18] sm:$0xff] %vm442_vm1, %v716_v61 }
 0x406   : > { %1019 = shalt.err (!%p1016_p5)
}
 0x407   : > { %s1020_s27 = scalar_lea.hbm %s1277_s25, 128  ;;  %s1024_s23 = scalar_lea.hbm %s1334_s9, 256 }
 0x408   : > { %p1021_p6 = scmp.ne.s32.totalorder %s1277_s25, %s1020_s27  ;;  %p1025_p10 = scmp.lt.u32.totalorder %s1277_s25, %s1334_s9 }
 0x409   : > { %p1026_p11 = scmp.lt.u32.totalorder %s1024_s23, %s1020_s27  ;;  %p1028_p13 = scmp.lt.u32.totalorder %s1020_s27, %s1277_s25 }
 0x40a   : > { %p1022_p7 = pnand %p1021_p6, %p1179_p4 }
 0x40b   : > { %p1027_p12 = por %p1026_p11, %p1025_p10 }
 0x40c   : > { %p1023_p9 = pneg %p1022_p7 }
 0x40d   : > { %p1029_p0 = por %p1028_p13, %p1027_p12 }
 0x40f   : > { %p1030_p1 = pnand %p1029_p0, %p1023_p9 }
 0x411   : > { %1033 = shalt.err (!%p1030_p1)
}
 0x412   : > { %933 = dma.vmem_to_hbm [thread:$0]  (%p1179_p4), %s1279_s20, 128, %s1277_s25, %s719_s26  }
 0x413 PF: > { %p939_p2 = scmp.ge.s32.totalorder %s1084_s14, 2  ;;  %s745_s29 = sand.u32 1, %s1064_s30  }
 0x414   : > { %s746_s28 = scalar_lea.sflag [#allocation5], %s745_s29 }
 0x415   : > { %p936_p3 = pnand %p939_p2, %p1186_p8 }
 0x417   : > { %1059 = dma.done.wait (!%p936_p3), %s746_s28, 128  }
 0x418   : > { %1061 = vsyncadd (!%p936_p3), %s746_s28, 4294967168  ;;  %s22_s14 = sadd.s32 1, %s1084_s14   ;;  %s1337_s30 = smov %s1068_s10 }
 0x419   : > { %p19_p5 = scmp.ge.s32.totalorder %s22_s14, 4   ;;  %s1338_s10 = smov %s1072_s11 }
 0x41a   : > { %s1339_s11 = smov %s1192_s22  ;;  %s1340_s12 = smov %s1080_s13 }
 0x41b   : > { %s1341_s13 = smov %s1343_s17  ;;  %21 = sbr.rel (!%p19_p5) target bundleno = 4 (0x4), region = 108 }
 0x422   :  { %751 = vsyncpa [#allocation5], 1 }
 0x423   :  { %753 = vsyncpa [#allocation5 + $0x1], 1 }

</bundles_post_ra>
